<compile_context>
chip_gen: v7x
topology: tpu7x:2x2x1
jax: 0.10.0
libtpu: 0.0.40
codegen_flags: <defaults>
</compile_context>

<pallas_src>
import jax
import jax.numpy as jnp
from jax.experimental import pallas as pl
from jax.experimental.pallas import tpu as pltpu

EPS = 1e-5
LANE = 128            # channel dims are padded to a multiple of this (lane-dense blocks)
MAX_ROW_TILE = 1024   # upper bound on rows per grid step in the stage-1 kernel
STAGE1_TILE_BUDGET = 8 * 1024 * 1024   # bytes for double-buffered activation tiles


def _round_up(x, m):
    return ((x + m - 1) // m) * m


# --------------------------- Pallas kernels ---------------------------------

def _stage1_kernel(x_ref, s1_ref, b1_ref, w1_ref, s2_ref, b2_ref, o_ref):
    # o = relu( (relu(x*s1 + b1) @ w1) * s2 + b2 )
    # BN math in f32, matmul inputs in the storage dtype (bf16), f32 accumulation.
    a = jnp.maximum(x_ref[...].astype(jnp.float32) * s1_ref[...] + b1_ref[...], 0.0)
    h = jnp.dot(a.astype(w1_ref.dtype), w1_ref[...], preferred_element_type=jnp.float32)
    o_ref[...] = jnp.maximum(h * s2_ref[...] + b2_ref[...], 0.0).astype(o_ref.dtype)


def _make_stage2_kernel(stride, Ho, Wo, fused_downsample):
    """3x3(stride) conv from VMEM windows -> BN3+ReLU -> 1x1 conv -> + residual.

    The residual is either read directly (identity shortcut) or computed in-kernel as
    BN+ReLU+1x1 projection of the (strided) block input (downsample shortcut)."""
    m2 = Ho * Wo

    def kernel(planes_ref, w2_ref, s3_ref, b3_ref, w3_ref, *rest):
        if fused_downsample:
            xs_ref, sds_ref, bds_ref, wds_ref, o_ref = rest
        else:
            r_ref, o_ref = rest

        cmid = w2_ref.shape[1]
        # 3x3 conv: 9 shifted windows of the parity planes (already BN2+ReLU'd and
        # zero-padded spatially), accumulated in f32.  No im2col slab in HBM.
        acc = jnp.zeros((m2, w2_ref.shape[2]), jnp.float32)
        t = 0
        for di in range(3):
            for dj in range(3):
                pidx = (di % stride) * stride + (dj % stride)
                oi, oj = di // stride, dj // stride
                win = planes_ref[pidx, oi:oi + Ho, oj:oj + Wo, :]
                # (Ho, Wo, C) -> (Ho*Wo, C): cheap when Wo is a multiple of 8.
                acc = acc + jnp.dot(win.reshape(m2, cmid), w2_ref[t],
                                    preferred_element_type=jnp.float32)
                t += 1

        # BN3 + ReLU + 1x1 conv (Cmid -> 4*Cmid)
        a3 = jnp.maximum(acc * s3_ref[...] + b3_ref[...], 0.0)
        out = jnp.dot(a3.astype(w3_ref.dtype), w3_ref[...],
                      preferred_element_type=jnp.float32)

        # residual
        if fused_downsample:
            a_sc = jnp.maximum(
                xs_ref[...].astype(jnp.float32) * sds_ref[...] + bds_ref[...], 0.0)
            res = jnp.dot(a_sc.astype(wds_ref.dtype), wds_ref[...],
                          preferred_element_type=jnp.float32)
        else:
            res = r_ref[...].astype(jnp.float32)

        o_ref[...] = (out + res).astype(o_ref.dtype)

    return kernel


# --------------------------- pallas_call wrappers -----------------------------

def _stage1_row_tile(m, kin, kout, itemsize):
    """VMEM-aware row tile: keep double-buffered in/out activation tiles under budget."""
    per_row = (kin + kout) * itemsize * 2          # input + output blocks, double-buffered
    tm = STAGE1_TILE_BUDGET // max(per_row, 1)
    tm = max(8, (min(tm, MAX_ROW_TILE) // 8) * 8)  # multiple of 8 sublanes
    return min(tm, _round_up(m, 8))


def fused_bn_relu_conv1x1_bn_relu(x2d, s1, b1, w1, s2, b2):
    """relu((relu(x*s1+b1) @ w1) * s2 + b2); rows tiled along a parallel grid axis."""
    m, kin = x2d.shape
    kout = w1.shape[1]
    tm = _stage1_row_tile(m, kin, kout, jnp.dtype(x2d.dtype).itemsize)
    mp = _round_up(m, tm)
    xp = x2d if mp == m else jnp.pad(x2d, ((0, mp - m), (0, 0)))

    out = pl.pallas_call(
        _stage1_kernel,
        out_shape=jax.ShapeDtypeStruct((mp, kout), x2d.dtype),
        grid=(mp // tm,),
        in_specs=[
            pl.BlockSpec((tm, kin), lambda i: (i, 0)),
            pl.BlockSpec((1, kin), lambda i: (0, 0)),
            pl.BlockSpec((1, kin), lambda i: (0, 0)),
            pl.BlockSpec((kin, kout), lambda i: (0, 0)),
            pl.BlockSpec((1, kout), lambda i: (0, 0)),
            pl.BlockSpec((1, kout), lambda i: (0, 0)),
        ],
        out_specs=pl.BlockSpec((tm, kout), lambda i: (i, 0)),
        compiler_params=pltpu.CompilerParams(
            dimension_semantics=("parallel",),
            vmem_limit_bytes=32 * 1024 * 1024),
    )(xp, s1.reshape(1, kin), b1.reshape(1, kin), w1,
      s2.reshape(1, kout), b2.reshape(1, kout))
    return out[:m]


def fused_conv3x3_bn_relu_conv1x1_residual(planes, w2, s3, b3, w3, *, stride, Ho, Wo,
                                           out_dtype, residual=None, ds_args=None):
    """Per-image stage-2 kernel: conv3x3(stride) -> BN3+ReLU -> conv1x1 -> + shortcut."""
    N, nplanes, Hp, Wp, cmid_p = planes.shape
    cexp_p = w3.shape[1]
    m2 = Ho * Wo
    fused_ds = residual is None

    kernel = _make_stage2_kernel(stride, Ho, Wo, fused_ds)

    in_specs = [
        pl.BlockSpec((None, nplanes, Hp, Wp, cmid_p), lambda n: (n, 0, 0, 0, 0)),
        pl.BlockSpec((9, cmid_p, cmid_p), lambda n: (0, 0, 0)),
        pl.BlockSpec((1, cmid_p), lambda n: (0, 0)),
        pl.BlockSpec((1, cmid_p), lambda n: (0, 0)),
        pl.BlockSpec((cmid_p, cexp_p), lambda n: (0, 0)),
    ]
    args = [planes, w2, s3.reshape(1, cmid_p), b3.reshape(1, cmid_p), w3]

    if fused_ds:
        xs, sds, bds, wds = ds_args
        cin_p = xs.shape[-1]
        in_specs += [
            pl.BlockSpec((None, m2, cin_p), lambda n: (n, 0, 0)),
            pl.BlockSpec((1, cin_p), lambda n: (0, 0)),
            pl.BlockSpec((1, cin_p), lambda n: (0, 0)),
            pl.BlockSpec((cin_p, cexp_p), lambda n: (0, 0)),
        ]
        args += [xs, sds.reshape(1, cin_p), bds.reshape(1, cin_p), wds]
    else:
        in_specs.append(pl.BlockSpec((None, m2, cexp_p), lambda n: (n, 0, 0)))
        args.append(residual)

    return pl.pallas_call(
        kernel,
        out_shape=jax.ShapeDtypeStruct((N, m2, cexp_p), out_dtype),
        grid=(N,),
        in_specs=in_specs,
        out_specs=pl.BlockSpec((None, m2, cexp_p), lambda n: (n, 0, 0)),
        compiler_params=pltpu.CompilerParams(
            dimension_semantics=("parallel",),
            vmem_limit_bytes=32 * 1024 * 1024),
    )(*args)


# --------------------------- host-side layout helpers -------------------------

def _pad_last_dim(x, c):
    if x.shape[-1] == c:
        return x
    cfg = [(0, 0)] * (x.ndim - 1) + [(0, c - x.shape[-1])]
    return jnp.pad(x, cfg)


def _pad2d(w, r, c):
    return jnp.pad(w, ((0, r - w.shape[0]), (0, c - w.shape[1])))


def _fold_bn(bn):
    gamma, beta, mean, var = bn
    s = gamma / jnp.sqrt(var + EPS)
    return s, beta - mean * s


def _fold_bn_padded(bn, cpad):
    s, b = _fold_bn(bn)
    # padded channels get scale=0 / bias=0 -> relu(0) = 0, so they never contribute.
    return (_pad_last_dim(s, cpad).astype(jnp.float32),
            _pad_last_dim(b, cpad).astype(jnp.float32))


def _make_tap_planes(act, stride):
    """Zero-pad spatially (pad=1) and split into stride*stride parity planes so that each
    of the nine 3x3-conv taps is a contiguous (Ho, Wo) window of one plane in VMEM.
    Activation (BN2+ReLU) was applied BEFORE this spatial zero-pad, so the border really
    contributes 0 to the conv (matches PyTorch semantics)."""
    N, H, W, C = act.shape
    ap = jnp.pad(act, ((0, 0), (1, 1), (1, 1), (0, 0)))
    Hp = -(-(H + 2) // stride)
    Wp = -(-(W + 2) // stride)
    planes = []
    for pi in range(stride):
        for pj in range(stride):
            p = ap[:, pi::stride, pj::stride, :]
            p = jnp.pad(p, ((0, 0), (0, Hp - p.shape[1]), (0, Wp - p.shape[2]), (0, 0)))
            planes.append(p)
    return jnp.stack(planes, axis=1)        # (N, stride*stride, Hp, Wp, C)


# --------------------------- parameters --------------------------------------

def init_params(key, cin, cout):
    cexp = cout * 4
    ks = jax.random.split(key, 8)

    def bn(k, c):
        k1, k2, k3, k4 = jax.random.split(k, 4)
        gamma = jax.random.uniform(k1, (c,), jnp.float32, 0.5, 1.5)
        beta = jax.random.normal(k2, (c,), jnp.float32) * 0.1
        mean = jax.random.normal(k3, (c,), jnp.float32) * 0.1
        var = jax.random.uniform(k4, (c,), jnp.float32, 0.5, 1.5)
        return (gamma, beta, mean, var)

    def conv_w(k, co, ci, kh, kw):  # PyTorch OIHW layout
        return jax.random.normal(k, (co, ci, kh, kw), jnp.float32) * 0.1

    return {
        "bn1": bn(ks[0], cin),
        "w1_t": conv_w(ks[1], cout, cin, 1, 1),
        "bn2": bn(ks[2], cout),
        "w2_t": conv_w(ks[3], cout, cout, 3, 3),
        "bn3": bn(ks[4], cout),
        "w3_t": conv_w(ks[5], cexp, cout, 1, 1),
        "bn_ds": bn(ks[6], cin),
        "wds_t": conv_w(ks[7], cexp, cin, 1, 1),
    }


# --------------------------- forward ------------------------------------------

def preact_bottleneck(x_nchw, params, in_channels, out_channels, stride,
                      compute_dtype=jnp.bfloat16):
    N, C, H, W = x_nchw.shape
    assert C == in_channels
    cexp = out_channels * 4
    cin_p = _round_up(in_channels, LANE)
    cmid_p = _round_up(out_channels, LANE)
    cexp_p = _round_up(cexp, LANE)
    Ho = (H - 1) // stride + 1
    Wo = (W - 1) // stride + 1

    # NHWC, channel-padded to lane multiples, storage in compute_dtype (bf16 default).
    x = jnp.transpose(x_nchw, (0, 2, 3, 1))
    x = _pad_last_dim(x, cin_p).astype(compute_dtype)

    s1, b1 = _fold_bn_padded(params["bn1"], cin_p)
    s2, b2 = _fold_bn_padded(params["bn2"], cmid_p)
    s3, b3 = _fold_bn_padded(params["bn3"], cmid_p)
    w1 = _pad2d(params["w1_t"].reshape(out_channels, in_channels).T,
                cin_p, cmid_p).astype(compute_dtype)
    w2 = jnp.transpose(params["w2_t"], (2, 3, 1, 0)).reshape(9, out_channels, out_channels)
    w2 = jnp.pad(w2, ((0, 0), (0, cmid_p - out_channels),
                      (0, cmid_p - out_channels))).astype(compute_dtype)
    w3 = _pad2d(params["w3_t"].reshape(cexp, out_channels).T,
                cmid_p, cexp_p).astype(compute_dtype)

    # Stage 1: BN1+ReLU -> 1x1 conv -> BN2+ReLU (single fused HBM pass).
    a2 = fused_bn_relu_conv1x1_bn_relu(x.reshape(N * H * W, cin_p), s1, b1, w1, s2, b2)
    a2 = a2.reshape(N, H, W, cmid_p)

    # Stage 2 input: parity planes of the spatially zero-padded activation.
    planes = _make_tap_planes(a2, stride)

    if stride == 1 and in_channels == cexp:          # identity shortcut (cin_p == cexp_p)
        residual, ds_args = x.reshape(N, Ho * Wo, cexp_p), None
    else:                                            # BN+ReLU+1x1(stride) projection, fused in-kernel
        sds, bds = _fold_bn_padded(params["bn_ds"], cin_p)
        wds = _pad2d(params["wds_t"].reshape(cexp, in_channels).T,
                     cin_p, cexp_p).astype(compute_dtype)
        xs = x[:, ::stride, ::stride, :].reshape(N, Ho * Wo, cin_p)
        residual, ds_args = None, (xs, sds, bds, wds)

    out = fused_conv3x3_bn_relu_conv1x1_residual(
        planes, w2, s3, b3, w3, stride=stride, Ho=Ho, Wo=Wo,
        out_dtype=compute_dtype, residual=residual, ds_args=ds_args)

    out = out.reshape(N, Ho, Wo, cexp_p)[..., :cexp]
    return jnp.transpose(out, (0, 3, 1, 2)).astype(x_nchw.dtype)


# --------------------------- pure-JAX reference -------------------------------

def ref_forward(x_nchw, params, in_channels, out_channels, stride):
    cexp = out_channels * 4

    def bnr(x, p):
        s, b = _fold_bn(p)
        return jnp.maximum(x * s[None, :, None, None] + b[None, :, None, None], 0.0)

    def conv(x, w, s=1, p=0):
        return jax.lax.conv_general_dilated(
            x, w, (s, s), [(p, p), (p, p)],
            dimension_numbers=("NCHW", "OIHW", "NCHW"))

    out = conv(bnr(x_nchw, params["bn1"]), params["w1_t"])
    out = conv(bnr(out, params["bn2"]), params["w2_t"], s=stride, p=1)
    out = conv(bnr(out, params["bn3"]), params["w3_t"])
    if stride != 1 or in_channels != cexp:
        sc = conv(bnr(x_nchw, params["bn_ds"]), params["wds_t"], s=stride)
    else:
        sc = x_nchw
    return sc + out


# --------------------------- main ---------------------------------------------

if __name__ == "__main__":
    key = jax.random.PRNGKey(0)
    kx, kp1, kp2 = jax.random.split(key, 3)

    fwd = jax.jit(preact_bottleneck, static_argnums=(2, 3, 4, 5))

    configs = [
        # (cin, cout, stride, param_key, expected_output_shape)
        (4, 4, 2, kp1, (2, 16, 8, 8)),     # downsample branch active
        (16, 4, 1, kp2, (2, 16, 16, 16)),  # identity shortcut
    ]
    for cin, cout, stride, kp, oshape in configs:
        x = jax.random.normal(kx, (2, cin, 16, 16), jnp.float32)
        params = init_params(kp, cin, cout)
        ref = ref_forward(x, params, cin, cout, stride)

        # f32 compute path: tight correctness check.
        out_f32 = jax.block_until_ready(fwd(x, params, cin, cout, stride, jnp.float32))
        assert out_f32.shape == oshape, out_f32.shape
        assert jnp.allclose(out_f32, ref, atol=2e-4, rtol=2e-4), \
            float(jnp.max(jnp.abs(out_f32 - ref)))

        # bf16 compute path (performance default): bf16-appropriate tolerance.
        out_bf16 = jax.block_until_ready(fwd(x, params, cin, cout, stride, jnp.bfloat16))
        assert out_bf16.shape == oshape, out_bf16.shape
        assert jnp.allclose(out_bf16, ref, atol=7e-2, rtol=7e-2), \
            float(jnp.max(jnp.abs(out_bf16 - ref)))

    print("KERNEL_OK")
</pallas_src>

<mosaic_0001>
module attributes {stable_mosaic.version = 11 : i64} {
  func.func @_stage1_kernel(%arg0: i32, %arg1: memref<512x128xf32, #tpu.memory_space<vmem>>, %arg2: memref<1x128xf32, #tpu.memory_space<vmem>>, %arg3: memref<1x128xf32, #tpu.memory_space<vmem>>, %arg4: memref<128x128xf32, #tpu.memory_space<vmem>>, %arg5: memref<1x128xf32, #tpu.memory_space<vmem>>, %arg6: memref<1x128xf32, #tpu.memory_space<vmem>>, %arg7: memref<512x128xf32, #tpu.memory_space<vmem>>) attributes {dimension_semantics = [#tpu.dimension_semantics<parallel>], iteration_bounds = array<i64: 1>, scalar_prefetch = 0 : i64, scratch_operands = 0 : i64, tpu.core_type = #tpu.core_type<tc>, window_params = [{transform_indices = @transform_0, window_bounds = array<i64: 512, 128>}, {pipeline_mode = #tpu.pipeline_mode<synchronous>, transform_indices = @transform_1, window_bounds = array<i64: 1, 128>}, {pipeline_mode = #tpu.pipeline_mode<synchronous>, transform_indices = @transform_2, window_bounds = array<i64: 1, 128>}, {pipeline_mode = #tpu.pipeline_mode<synchronous>, transform_indices = @transform_3, window_bounds = array<i64: 128, 128>}, {pipeline_mode = #tpu.pipeline_mode<synchronous>, transform_indices = @transform_4, window_bounds = array<i64: 1, 128>}, {pipeline_mode = #tpu.pipeline_mode<synchronous>, transform_indices = @transform_5, window_bounds = array<i64: 1, 128>}, {transform_indices = @transform_6, window_bounds = array<i64: 512, 128>}]} {
    %c0 = arith.constant 0 : index
    %c0_0 = arith.constant 0 : index
    %0 = vector.load %arg1[%c0, %c0_0] : memref<512x128xf32, #tpu.memory_space<vmem>>, vector<512x128xf32>
    %c0_1 = arith.constant 0 : index
    %c0_2 = arith.constant 0 : index
    %1 = vector.load %arg2[%c0_1, %c0_2] : memref<1x128xf32, #tpu.memory_space<vmem>>, vector<1x128xf32>
    %2 = vector.broadcast %1 : vector<1x128xf32> to vector<512x128xf32>
    %3 = arith.mulf %0, %2 : vector<512x128xf32>
    %c0_3 = arith.constant 0 : index
    %c0_4 = arith.constant 0 : index
    %4 = vector.load %arg3[%c0_3, %c0_4] : memref<1x128xf32, #tpu.memory_space<vmem>>, vector<1x128xf32>
    %5 = vector.broadcast %4 : vector<1x128xf32> to vector<512x128xf32>
    %6 = arith.addf %3, %5 : vector<512x128xf32>
    %cst = arith.constant 0.000000e+00 : f32
    %7 = vector.broadcast %cst : f32 to vector<512x128xf32>
    %8 = arith.maximumf %6, %7 : vector<512x128xf32>
    %c0_5 = arith.constant 0 : index
    %c0_6 = arith.constant 0 : index
    %9 = vector.load %arg4[%c0_5, %c0_6] : memref<128x128xf32, #tpu.memory_space<vmem>>, vector<128x128xf32>
    %cst_7 = arith.constant dense<0.000000e+00> : vector<512x128xf32>
    %10 = tpu.matmul %8, %9, %cst_7 {dimension_numbers = #tpu.dot_dimension_numbers<[1], [0], [0], [1], [0, 0, 1, 1], [], []>} : vector<512x128xf32>, vector<128x128xf32>, vector<512x128xf32> -> vector<512x128xf32>
    %c0_8 = arith.constant 0 : index
    %c0_9 = arith.constant 0 : index
    %11 = vector.load %arg5[%c0_8, %c0_9] : memref<1x128xf32, #tpu.memory_space<vmem>>, vector<1x128xf32>
    %12 = vector.broadcast %11 : vector<1x128xf32> to vector<512x128xf32>
    %13 = arith.mulf %10, %12 : vector<512x128xf32>
    %c0_10 = arith.constant 0 : index
    %c0_11 = arith.constant 0 : index
    %14 = vector.load %arg6[%c0_10, %c0_11] : memref<1x128xf32, #tpu.memory_space<vmem>>, vector<1x128xf32>
    %15 = vector.broadcast %14 : vector<1x128xf32> to vector<512x128xf32>
    %16 = arith.addf %13, %15 : vector<512x128xf32>
    %cst_12 = arith.constant 0.000000e+00 : f32
    %17 = vector.broadcast %cst_12 : f32 to vector<512x128xf32>
    %18 = arith.maximumf %16, %17 : vector<512x128xf32>
    %c0_13 = arith.constant 0 : index
    %c0_14 = arith.constant 0 : index
    %19 = vector.load %arg7[%c0_13, %c0_14] : memref<512x128xf32, #tpu.memory_space<vmem>>, vector<512x128xf32>
    tpu.vector_store %arg7[%c0_13, %c0_14], %18 {strides = array<i32>} : memref<512x128xf32, #tpu.memory_space<vmem>>, vector<512x128xf32>,
    return
  }
  func.func @transform_0(%arg0: i32) -> (i32, i32) {
    %c0_i32 = arith.constant 0 : i32
    %c0_i32_0 = arith.constant 0 : i32
    return %arg0, %c0_i32 : i32, i32
  }
  func.func @transform_1(%arg0: i32) -> (i32, i32) {
    %c0_i32 = arith.constant 0 : i32
    %c0_i32_0 = arith.constant 0 : i32
    %c0_i32_1 = arith.constant 0 : i32
    return %c0_i32, %c0_i32_0 : i32, i32
  }
  func.func @transform_2(%arg0: i32) -> (i32, i32) {
    %c0_i32 = arith.constant 0 : i32
    %c0_i32_0 = arith.constant 0 : i32
    %c0_i32_1 = arith.constant 0 : i32
    return %c0_i32, %c0_i32_0 : i32, i32
  }
  func.func @transform_3(%arg0: i32) -> (i32, i32) {
    %c0_i32 = arith.constant 0 : i32
    %c0_i32_0 = arith.constant 0 : i32
    %c0_i32_1 = arith.constant 0 : i32
    return %c0_i32, %c0_i32_0 : i32, i32
  }
  func.func @transform_4(%arg0: i32) -> (i32, i32) {
    %c0_i32 = arith.constant 0 : i32
    %c0_i32_0 = arith.constant 0 : i32
    %c0_i32_1 = arith.constant 0 : i32
    return %c0_i32, %c0_i32_0 : i32, i32
  }
  func.func @transform_5(%arg0: i32) -> (i32, i32) {
    %c0_i32 = arith.constant 0 : i32
    %c0_i32_0 = arith.constant 0 : i32
    %c0_i32_1 = arith.constant 0 : i32
    return %c0_i32, %c0_i32_0 : i32, i32
  }
  func.func @transform_6(%arg0: i32) -> (i32, i32) {
    %c0_i32 = arith.constant 0 : i32
    %c0_i32_0 = arith.constant 0 : i32
    return %arg0, %c0_i32 : i32, i32
  }
}

module attributes {stable_mosaic.version = 11 : i64} {
  func.func @kernel(%arg0: i32, %arg1: memref<1x4x9x9x128xf32, #tpu.memory_space<vmem>>, %arg2: memref<9x128x128xf32, #tpu.memory_space<vmem>>, %arg3: memref<1x128xf32, #tpu.memory_space<vmem>>, %arg4: memref<1x128xf32, #tpu.memory_space<vmem>>, %arg5: memref<128x128xf32, #tpu.memory_space<vmem>>, %arg6: memref<1x64x128xf32, #tpu.memory_space<vmem>>, %arg7: memref<1x128xf32, #tpu.memory_space<vmem>>, %arg8: memref<1x128xf32, #tpu.memory_space<vmem>>, %arg9: memref<128x128xf32, #tpu.memory_space<vmem>>, %arg10: memref<1x64x128xf32, #tpu.memory_space<vmem>>) attributes {dimension_semantics = [#tpu.dimension_semantics<parallel>], iteration_bounds = array<i64: 2>, scalar_prefetch = 0 : i64, scratch_operands = 0 : i64, tpu.core_type = #tpu.core_type<tc>, window_params = [{transform_indices = @transform_0, window_bounds = array<i64: 1, 4, 9, 9, 128>}, {pipeline_mode = #tpu.pipeline_mode<synchronous>, transform_indices = @transform_1, window_bounds = array<i64: 9, 128, 128>}, {pipeline_mode = #tpu.pipeline_mode<synchronous>, transform_indices = @transform_2, window_bounds = array<i64: 1, 128>}, {pipeline_mode = #tpu.pipeline_mode<synchronous>, transform_indices = @transform_3, window_bounds = array<i64: 1, 128>}, {pipeline_mode = #tpu.pipeline_mode<synchronous>, transform_indices = @transform_4, window_bounds = array<i64: 128, 128>}, {transform_indices = @transform_5, window_bounds = array<i64: 1, 64, 128>}, {pipeline_mode = #tpu.pipeline_mode<synchronous>, transform_indices = @transform_6, window_bounds = array<i64: 1, 128>}, {pipeline_mode = #tpu.pipeline_mode<synchronous>, transform_indices = @transform_7, window_bounds = array<i64: 1, 128>}, {pipeline_mode = #tpu.pipeline_mode<synchronous>, transform_indices = @transform_8, window_bounds = array<i64: 128, 128>}, {transform_indices = @transform_9, window_bounds = array<i64: 1, 64, 128>}]} {
    %cst = arith.constant 0.000000e+00 : f32
    %0 = vector.broadcast %cst : f32 to vector<64x128xf32>
    %c0 = arith.constant 0 : index
    %c0_0 = arith.constant 0 : index
    %c0_1 = arith.constant 0 : index
    %c0_2 = arith.constant 0 : index
    %c0_3 = arith.constant 0 : index
    %1 = vector.load %arg1[%c0, %c0_0, %c0_1, %c0_2, %c0_3] : memref<1x4x9x9x128xf32, #tpu.memory_space<vmem>>, vector<1x1x8x8x128xf32>
    %2 = vector.shape_cast %1 : vector<1x1x8x8x128xf32> to vector<8x8x128xf32>
    %3 = vector.shape_cast %2 : vector<8x8x128xf32> to vector<64x128xf32>
    %c0_4 = arith.constant 0 : index
    %c0_5 = arith.constant 0 : index
    %c0_6 = arith.constant 0 : index
    %4 = vector.load %arg2[%c0_4, %c0_5, %c0_6] : memref<9x128x128xf32, #tpu.memory_space<vmem>>, vector<1x128x128xf32>
    %5 = vector.shape_cast %4 : vector<1x128x128xf32> to vector<128x128xf32>
    %cst_7 = arith.constant dense<0.000000e+00> : vector<64x128xf32>
    %6 = tpu.matmul %3, %5, %cst_7 {dimension_numbers = #tpu.dot_dimension_numbers<[1], [0], [0], [1], [0, 0, 1, 1], [], []>} : vector<64x128xf32>, vector<128x128xf32>, vector<64x128xf32> -> vector<64x128xf32>
    %7 = arith.addf %0, %6 : vector<64x128xf32>
    %c0_8 = arith.constant 0 : index
    %c1 = arith.constant 1 : index
    %c0_9 = arith.constant 0 : index
    %c0_10 = arith.constant 0 : index
    %c0_11 = arith.constant 0 : index
    %8 = vector.load %arg1[%c0_8, %c1, %c0_9, %c0_10, %c0_11] : memref<1x4x9x9x128xf32, #tpu.memory_space<vmem>>, vector<1x1x8x8x128xf32>
    %9 = vector.shape_cast %8 : vector<1x1x8x8x128xf32> to vector<8x8x128xf32>
    %10 = vector.shape_cast %9 : vector<8x8x128xf32> to vector<64x128xf32>
    %c1_12 = arith.constant 1 : index
    %c0_13 = arith.constant 0 : index
    %c0_14 = arith.constant 0 : index
    %11 = vector.load %arg2[%c1_12, %c0_13, %c0_14] : memref<9x128x128xf32, #tpu.memory_space<vmem>>, vector<1x128x128xf32>
    %12 = vector.shape_cast %11 : vector<1x128x128xf32> to vector<128x128xf32>
    %cst_15 = arith.constant dense<0.000000e+00> : vector<64x128xf32>
    %13 = tpu.matmul %10, %12, %cst_15 {dimension_numbers = #tpu.dot_dimension_numbers<[1], [0], [0], [1], [0, 0, 1, 1], [], []>} : vector<64x128xf32>, vector<128x128xf32>, vector<64x128xf32> -> vector<64x128xf32>
    %14 = arith.addf %7, %13 : vector<64x128xf32>
    %c0_16 = arith.constant 0 : index
    %c0_17 = arith.constant 0 : index
    %c0_18 = arith.constant 0 : index
    %c1_19 = arith.constant 1 : index
    %c0_20 = arith.constant 0 : index
    %15 = vector.load %arg1[%c0_16, %c0_17, %c0_18, %c1_19, %c0_20] : memref<1x4x9x9x128xf32, #tpu.memory_space<vmem>>, vector<1x1x8x8x128xf32>
    %16 = vector.shape_cast %15 : vector<1x1x8x8x128xf32> to vector<8x8x128xf32>
    %17 = vector.shape_cast %16 : vector<8x8x128xf32> to vector<64x128xf32>
    %c2 = arith.constant 2 : index
    %c0_21 = arith.constant 0 : index
    %c0_22 = arith.constant 0 : index
    %18 = vector.load %arg2[%c2, %c0_21, %c0_22] : memref<9x128x128xf32, #tpu.memory_space<vmem>>, vector<1x128x128xf32>
    %19 = vector.shape_cast %18 : vector<1x128x128xf32> to vector<128x128xf32>
    %cst_23 = arith.constant dense<0.000000e+00> : vector<64x128xf32>
    %20 = tpu.matmul %17, %19, %cst_23 {dimension_numbers = #tpu.dot_dimension_numbers<[1], [0], [0], [1], [0, 0, 1, 1], [], []>} : vector<64x128xf32>, vector<128x128xf32>, vector<64x128xf32> -> vector<64x128xf32>
    %21 = arith.addf %14, %20 : vector<64x128xf32>
    %c0_24 = arith.constant 0 : index
    %c2_25 = arith.constant 2 : index
    %c0_26 = arith.constant 0 : index
    %c0_27 = arith.constant 0 : index
    %c0_28 = arith.constant 0 : index
    %22 = vector.load %arg1[%c0_24, %c2_25, %c0_26, %c0_27, %c0_28] : memref<1x4x9x9x128xf32, #tpu.memory_space<vmem>>, vector<1x1x8x8x128xf32>
    %23 = vector.shape_cast %22 : vector<1x1x8x8x128xf32> to vector<8x8x128xf32>
    %24 = vector.shape_cast %23 : vector<8x8x128xf32> to vector<64x128xf32>
    %c3 = arith.constant 3 : index
    %c0_29 = arith.constant 0 : index
    %c0_30 = arith.constant 0 : index
    %25 = vector.load %arg2[%c3, %c0_29, %c0_30] : memref<9x128x128xf32, #tpu.memory_space<vmem>>, vector<1x128x128xf32>
    %26 = vector.shape_cast %25 : vector<1x128x128xf32> to vector<128x128xf32>
    %cst_31 = arith.constant dense<0.000000e+00> : vector<64x128xf32>
    %27 = tpu.matmul %24, %26, %cst_31 {dimension_numbers = #tpu.dot_dimension_numbers<[1], [0], [0], [1], [0, 0, 1, 1], [], []>} : vector<64x128xf32>, vector<128x128xf32>, vector<64x128xf32> -> vector<64x128xf32>
    %28 = arith.addf %21, %27 : vector<64x128xf32>
    %c0_32 = arith.constant 0 : index
    %c3_33 = arith.constant 3 : index
    %c0_34 = arith.constant 0 : index
    %c0_35 = arith.constant 0 : index
    %c0_36 = arith.constant 0 : index
    %29 = vector.load %arg1[%c0_32, %c3_33, %c0_34, %c0_35, %c0_36] : memref<1x4x9x9x128xf32, #tpu.memory_space<vmem>>, vector<1x1x8x8x128xf32>
    %30 = vector.shape_cast %29 : vector<1x1x8x8x128xf32> to vector<8x8x128xf32>
    %31 = vector.shape_cast %30 : vector<8x8x128xf32> to vector<64x128xf32>
    %c4 = arith.constant 4 : index
    %c0_37 = arith.constant 0 : index
    %c0_38 = arith.constant 0 : index
    %32 = vector.load %arg2[%c4, %c0_37, %c0_38] : memref<9x128x128xf32, #tpu.memory_space<vmem>>, vector<1x128x128xf32>
    %33 = vector.shape_cast %32 : vector<1x128x128xf32> to vector<128x128xf32>
    %cst_39 = arith.constant dense<0.000000e+00> : vector<64x128xf32>
    %34 = tpu.matmul %31, %33, %cst_39 {dimension_numbers = #tpu.dot_dimension_numbers<[1], [0], [0], [1], [0, 0, 1, 1], [], []>} : vector<64x128xf32>, vector<128x128xf32>, vector<64x128xf32> -> vector<64x128xf32>
    %35 = arith.addf %28, %34 : vector<64x128xf32>
    %c0_40 = arith.constant 0 : index
    %c2_41 = arith.constant 2 : index
    %c0_42 = arith.constant 0 : index
    %c1_43 = arith.constant 1 : index
    %c0_44 = arith.constant 0 : index
    %36 = vector.load %arg1[%c0_40, %c2_41, %c0_42, %c1_43, %c0_44] : memref<1x4x9x9x128xf32, #tpu.memory_space<vmem>>, vector<1x1x8x8x128xf32>
    %37 = vector.shape_cast %36 : vector<1x1x8x8x128xf32> to vector<8x8x128xf32>
    %38 = vector.shape_cast %37 : vector<8x8x128xf32> to vector<64x128xf32>
    %c5 = arith.constant 5 : index
    %c0_45 = arith.constant 0 : index
    %c0_46 = arith.constant 0 : index
    %39 = vector.load %arg2[%c5, %c0_45, %c0_46] : memref<9x128x128xf32, #tpu.memory_space<vmem>>, vector<1x128x128xf32>
    %40 = vector.shape_cast %39 : vector<1x128x128xf32> to vector<128x128xf32>
    %cst_47 = arith.constant dense<0.000000e+00> : vector<64x128xf32>
    %41 = tpu.matmul %38, %40, %cst_47 {dimension_numbers = #tpu.dot_dimension_numbers<[1], [0], [0], [1], [0, 0, 1, 1], [], []>} : vector<64x128xf32>, vector<128x128xf32>, vector<64x128xf32> -> vector<64x128xf32>
    %42 = arith.addf %35, %41 : vector<64x128xf32>
    %c0_48 = arith.constant 0 : index
    %c0_49 = arith.constant 0 : index
    %c1_50 = arith.constant 1 : index
    %c0_51 = arith.constant 0 : index
    %c0_52 = arith.constant 0 : index
    %43 = vector.load %arg1[%c0_48, %c0_49, %c1_50, %c0_51, %c0_52] : memref<1x4x9x9x128xf32, #tpu.memory_space<vmem>>, vector<1x1x8x8x128xf32>
    %44 = vector.shape_cast %43 : vector<1x1x8x8x128xf32> to vector<8x8x128xf32>
    %45 = vector.shape_cast %44 : vector<8x8x128xf32> to vector<64x128xf32>
    %c6 = arith.constant 6 : index
    %c0_53 = arith.constant 0 : index
    %c0_54 = arith.constant 0 : index
    %46 = vector.load %arg2[%c6, %c0_53, %c0_54] : memref<9x128x128xf32, #tpu.memory_space<vmem>>, vector<1x128x128xf32>
    %47 = vector.shape_cast %46 : vector<1x128x128xf32> to vector<128x128xf32>
    %cst_55 = arith.constant dense<0.000000e+00> : vector<64x128xf32>
    %48 = tpu.matmul %45, %47, %cst_55 {dimension_numbers = #tpu.dot_dimension_numbers<[1], [0], [0], [1], [0, 0, 1, 1], [], []>} : vector<64x128xf32>, vector<128x128xf32>, vector<64x128xf32> -> vector<64x128xf32>
    %49 = arith.addf %42, %48 : vector<64x128xf32>
    %c0_56 = arith.constant 0 : index
    %c1_57 = arith.constant 1 : index
    %c1_58 = arith.constant 1 : index
    %c0_59 = arith.constant 0 : index
    %c0_60 = arith.constant 0 : index
    %50 = vector.load %arg1[%c0_56, %c1_57, %c1_58, %c0_59, %c0_60] : memref<1x4x9x9x128xf32, #tpu.memory_space<vmem>>, vector<1x1x8x8x128xf32>
    %51 = vector.shape_cast %50 : vector<1x1x8x8x128xf32> to vector<8x8x128xf32>
    %52 = vector.shape_cast %51 : vector<8x8x128xf32> to vector<64x128xf32>
    %c7 = arith.constant 7 : index
    %c0_61 = arith.constant 0 : index
    %c0_62 = arith.constant 0 : index
    %53 = vector.load %arg2[%c7, %c0_61, %c0_62] : memref<9x128x128xf32, #tpu.memory_space<vmem>>, vector<1x128x128xf32>
    %54 = vector.shape_cast %53 : vector<1x128x128xf32> to vector<128x128xf32>
    %cst_63 = arith.constant dense<0.000000e+00> : vector<64x128xf32>
    %55 = tpu.matmul %52, %54, %cst_63 {dimension_numbers = #tpu.dot_dimension_numbers<[1], [0], [0], [1], [0, 0, 1, 1], [], []>} : vector<64x128xf32>, vector<128x128xf32>, vector<64x128xf32> -> vector<64x128xf32>
    %56 = arith.addf %49, %55 : vector<64x128xf32>
    %c0_64 = arith.constant 0 : index
    %c0_65 = arith.constant 0 : index
    %c1_66 = arith.constant 1 : index
    %c1_67 = arith.constant 1 : index
    %c0_68 = arith.constant 0 : index
    %57 = vector.load %arg1[%c0_64, %c0_65, %c1_66, %c1_67, %c0_68] : memref<1x4x9x9x128xf32, #tpu.memory_space<vmem>>, vector<1x1x8x8x128xf32>
    %58 = vector.shape_cast %57 : vector<1x1x8x8x128xf32> to vector<8x8x128xf32>
    %59 = vector.shape_cast %58 : vector<8x8x128xf32> to vector<64x128xf32>
    %c8 = arith.constant 8 : index
    %c0_69 = arith.constant 0 : index
    %c0_70 = arith.constant 0 : index
    %60 = vector.load %arg2[%c8, %c0_69, %c0_70] : memref<9x128x128xf32, #tpu.memory_space<vmem>>, vector<1x128x128xf32>
    %61 = vector.shape_cast %60 : vector<1x128x128xf32> to vector<128x128xf32>
    %cst_71 = arith.constant dense<0.000000e+00> : vector<64x128xf32>
    %62 = tpu.matmul %59, %61, %cst_71 {dimension_numbers = #tpu.dot_dimension_numbers<[1], [0], [0], [1], [0, 0, 1, 1], [], []>} : vector<64x128xf32>, vector<128x128xf32>, vector<64x128xf32> -> vector<64x128xf32>
    %63 = arith.addf %56, %62 : vector<64x128xf32>
    %c0_72 = arith.constant 0 : index
    %c0_73 = arith.constant 0 : index
    %64 = vector.load %arg3[%c0_72, %c0_73] : memref<1x128xf32, #tpu.memory_space<vmem>>, vector<1x128xf32>
    %65 = vector.broadcast %64 : vector<1x128xf32> to vector<64x128xf32>
    %66 = arith.mulf %63, %65 : vector<64x128xf32>
    %c0_74 = arith.constant 0 : index
    %c0_75 = arith.constant 0 : index
    %67 = vector.load %arg4[%c0_74, %c0_75] : memref<1x128xf32, #tpu.memory_space<vmem>>, vector<1x128xf32>
    %68 = vector.broadcast %67 : vector<1x128xf32> to vector<64x128xf32>
    %69 = arith.addf %66, %68 : vector<64x128xf32>
    %cst_76 = arith.constant 0.000000e+00 : f32
    %70 = vector.broadcast %cst_76 : f32 to vector<64x128xf32>
    %71 = arith.maximumf %69, %70 : vector<64x128xf32>
    %c0_77 = arith.constant 0 : index
    %c0_78 = arith.constant 0 : index
    %72 = vector.load %arg5[%c0_77, %c0_78] : memref<128x128xf32, #tpu.memory_space<vmem>>, vector<128x128xf32>
    %cst_79 = arith.constant dense<0.000000e+00> : vector<64x128xf32>
    %73 = tpu.matmul %71, %72, %cst_79 {dimension_numbers = #tpu.dot_dimension_numbers<[1], [0], [0], [1], [0, 0, 1, 1], [], []>} : vector<64x128xf32>, vector<128x128xf32>, vector<64x128xf32> -> vector<64x128xf32>
    %c0_80 = arith.constant 0 : index
    %c0_81 = arith.constant 0 : index
    %c0_82 = arith.constant 0 : index
    %74 = vector.load %arg6[%c0_80, %c0_81, %c0_82] : memref<1x64x128xf32, #tpu.memory_space<vmem>>, vector<1x64x128xf32>
    %75 = vector.shape_cast %74 : vector<1x64x128xf32> to vector<64x128xf32>
    %c0_83 = arith.constant 0 : index
    %c0_84 = arith.constant 0 : index
    %76 = vector.load %arg7[%c0_83, %c0_84] : memref<1x128xf32, #tpu.memory_space<vmem>>, vector<1x128xf32>
    %77 = vector.broadcast %76 : vector<1x128xf32> to vector<64x128xf32>
    %78 = arith.mulf %75, %77 : vector<64x128xf32>
    %c0_85 = arith.constant 0 : index
    %c0_86 = arith.constant 0 : index
    %79 = vector.load %arg8[%c0_85, %c0_86] : memref<1x128xf32, #tpu.memory_space<vmem>>, vector<1x128xf32>
    %80 = vector.broadcast %79 : vector<1x128xf32> to vector<64x128xf32>
    %81 = arith.addf %78, %80 : vector<64x128xf32>
    %cst_87 = arith.constant 0.000000e+00 : f32
    %82 = vector.broadcast %cst_87 : f32 to vector<64x128xf32>
    %83 = arith.maximumf %81, %82 : vector<64x128xf32>
    %c0_88 = arith.constant 0 : index
    %c0_89 = arith.constant 0 : index
    %84 = vector.load %arg9[%c0_88, %c0_89] : memref<128x128xf32, #tpu.memory_space<vmem>>, vector<128x128xf32>
    %cst_90 = arith.constant dense<0.000000e+00> : vector<64x128xf32>
    %85 = tpu.matmul %83, %84, %cst_90 {dimension_numbers = #tpu.dot_dimension_numbers<[1], [0], [0], [1], [0, 0, 1, 1], [], []>} : vector<64x128xf32>, vector<128x128xf32>, vector<64x128xf32> -> vector<64x128xf32>
    %86 = arith.addf %73, %85 : vector<64x128xf32>
    %c0_91 = arith.constant 0 : index
    %c0_92 = arith.constant 0 : index
    %c0_93 = arith.constant 0 : index
    %87 = vector.load %arg10[%c0_91, %c0_92, %c0_93] : memref<1x64x128xf32, #tpu.memory_space<vmem>>, vector<1x64x128xf32>
    %88 = vector.shape_cast %87 : vector<1x64x128xf32> to vector<64x128xf32>
    %89 = vector.shape_cast %86 : vector<64x128xf32> to vector<1x64x128xf32>
    tpu.vector_store %arg10[%c0_91, %c0_92, %c0_93], %89 {strides = array<i32>} : memref<1x64x128xf32, #tpu.memory_space<vmem>>, vector<1x64x128xf32>,
    return
  }
  func.func @transform_0(%arg0: i32) -> (i32, i32, i32, i32, i32) {
    %c0_i32 = arith.constant 0 : i32
    %c0_i32_0 = arith.constant 0 : i32
    %c0_i32_1 = arith.constant 0 : i32
    %c0_i32_2 = arith.constant 0 : i32
    %c0_i32_3 = arith.constant 0 : i32
    return %arg0, %c0_i32, %c0_i32_0, %c0_i32_1, %c0_i32_2 : i32, i32, i32, i32, i32
  }
  func.func @transform_1(%arg0: i32) -> (i32, i32, i32) {
    %c0_i32 = arith.constant 0 : i32
    %c0_i32_0 = arith.constant 0 : i32
    %c0_i32_1 = arith.constant 0 : i32
    %c0_i32_2 = arith.constant 0 : i32
    return %c0_i32, %c0_i32_0, %c0_i32_1 : i32, i32, i32
  }
  func.func @transform_2(%arg0: i32) -> (i32, i32) {
    %c0_i32 = arith.constant 0 : i32
    %c0_i32_0 = arith.constant 0 : i32
    %c0_i32_1 = arith.constant 0 : i32
    return %c0_i32, %c0_i32_0 : i32, i32
  }
  func.func @transform_3(%arg0: i32) -> (i32, i32) {
    %c0_i32 = arith.constant 0 : i32
    %c0_i32_0 = arith.constant 0 : i32
    %c0_i32_1 = arith.constant 0 : i32
    return %c0_i32, %c0_i32_0 : i32, i32
  }
  func.func @transform_4(%arg0: i32) -> (i32, i32) {
    %c0_i32 = arith.constant 0 : i32
    %c0_i32_0 = arith.constant 0 : i32
    %c0_i32_1 = arith.constant 0 : i32
    return %c0_i32, %c0_i32_0 : i32, i32
  }
  func.func @transform_5(%arg0: i32) -> (i32, i32, i32) {
    %c0_i32 = arith.constant 0 : i32
    %c0_i32_0 = arith.constant 0 : i32
    %c0_i32_1 = arith.constant 0 : i32
    return %arg0, %c0_i32, %c0_i32_0 : i32, i32, i32
  }
  func.func @transform_6(%arg0: i32) -> (i32, i32) {
    %c0_i32 = arith.constant 0 : i32
    %c0_i32_0 = arith.constant 0 : i32
    %c0_i32_1 = arith.constant 0 : i32
    return %c0_i32, %c0_i32_0 : i32, i32
  }
  func.func @transform_7(%arg0: i32) -> (i32, i32) {
    %c0_i32 = arith.constant 0 : i32
    %c0_i32_0 = arith.constant 0 : i32
    %c0_i32_1 = arith.constant 0 : i32
    return %c0_i32, %c0_i32_0 : i32, i32
  }
  func.func @transform_8(%arg0: i32) -> (i32, i32) {
    %c0_i32 = arith.constant 0 : i32
    %c0_i32_0 = arith.constant 0 : i32
    %c0_i32_1 = arith.constant 0 : i32
    return %c0_i32, %c0_i32_0 : i32, i32
  }
  func.func @transform_9(%arg0: i32) -> (i32, i32, i32) {
    %c0_i32 = arith.constant 0 : i32
    %c0_i32_0 = arith.constant 0 : i32
    %c0_i32_1 = arith.constant 0 : i32
    return %arg0, %c0_i32, %c0_i32_0 : i32, i32, i32
  }
}

</mosaic_0001>

<bundles_post_ra>
// kernel: preact_bottleneck.2
= control target key start
LH: loop header
LB: loop body
LE: loop exit
PB: predicated region body
PF: predicated region fallthrough
CT: control target
= control target key end

     0   :  { %s2108_s3 = inlined_call_operand.vmem [shape: f32[128,128], index: 3, kind: input, shape index: {}]   ;;  %s2109_s0 = inlined_call_operand.vmem [shape: f32[512,128], index: 0, kind: input, shape index: {}]   ;;  %s2110_s1 = inlined_call_operand.vmem [shape: f32[1,128], index: 1, kind: input, shape index: {}]   ;;  %s2111_s2 = inlined_call_operand.vmem [shape: f32[1,128], index: 2, kind: input, shape index: {}]   ;;  %s2112_s4 = inlined_call_operand.vmem [shape: f32[1,128], index: 4, kind: input, shape index: {}]   ;;  %s2113_s5 = inlined_call_operand.vmem [shape: f32[1,128], index: 5, kind: input, shape index: {}]   ;;  %s2114_s6 = inlined_call_operand.vmem [shape: f32[512,128], index: 6, kind: output, shape index: {}]  }
   0x1   :  { %v293_v0 = vld [vmem:[%s2108_s3] sm:$0xff]  ;;  %v294_v1 = vld [vmem:[%s2108_s3 + $0x8] sm:$0xff]  ;;  %v295_v2 = vld [vmem:[%s2108_s3 + $0x10] sm:$0xff] }
   0x2   :  { %v1180_v3 = vpack.c.bf16 %v294_v1, %v293_v0  ;;  %v296_v4 = vld [vmem:[%s2108_s3 + $0x18] sm:$0xff]  ;;  %v297_v6 = vld [vmem:[%s2108_s3 + $0x20] sm:$0xff]  ;;  %v298_v7 = vld [vmem:[%s2108_s3 + $0x28] sm:$0xff] }
   0x3   :  { %v1184_v5 = vpack.c.bf16 %v296_v4, %v295_v2  ;;  %v1188_v8 = vpack.c.bf16 %v298_v7, %v297_v6  ;;  %v299_v9 = vld [vmem:[%s2108_s3 + $0x30] sm:$0xff]  ;;  %v23_v10 = vld [vmem:[%s2109_s0] sm:$0xff]  ;;  %v300_v12 = vld [vmem:[%s2108_s3 + $0x38] sm:$0xff] }
   0x4   :  { %1181 = vmatprep.subr.bf16.mxu0 %v1180_v3  ;;  %1212 = vmatprep.subr.bf16.mxu1 %v1180_v3  ;;  %v1290_v11 = vld [vmem:[%s2110_s1] ss:$0 sm:$0xff]  ;;  %v1192_v18 = vpack.c.bf16 %v300_v12, %v299_v9  ;;  %v302_v21 = vld [vmem:[%s2108_s3 + $0x48] sm:$0xff]  ;;  %v303_v25 = vld [vmem:[%s2108_s3 + $0x50] sm:$0xff] }
   0x5   :  { %1183 = vmatpush3.bf16.msra.mxu0 %v1180_v3  ;;  %1220 = vmatpush3.bf16.msra.mxu1 %v1180_v3  ;;  %v94_v13 = vmul.f32 %v1290_v11, %v23_v10  ;;  %v1299_v14 = vld [vmem:[%s2111_s2] ss:$0 sm:$0xff]  ;;  %v304_v26 = vld [vmem:[%s2108_s3 + $0x58] sm:$0xff]  ;;  %v24_v28 = vld [vmem:[%s2109_s0 + $0x8] sm:$0xff] }
   0x6   :  { %1185 = vmatprep.subr.bf16.mxu0 %v1184_v5  ;;  %1213 = vmatprep.subr.bf16.mxu1 %v1184_v5  ;;  %v55_v15 = vld [vmem:[%s2109_s0 + $0x100] sm:$0xff]  ;;  %v1200_v27 = vpack.c.bf16 %v304_v26, %v303_v25  ;;  %v306_v30 = vld [vmem:[%s2108_s3 + $0x68] sm:$0xff]  ;;  %v25_v32 = vld [vmem:[%s2109_s0 + $0x10] sm:$0xff]  ;;  %v95_v33 = vmul.f32 %v1290_v11, %v24_v28 }
   0x7   :  { %v126_v16 = vmul.f32 %v1290_v11, %v55_v15  ;;  %v165_v17 = vadd.f32 %v1299_v14, %v94_v13  ;;  %v301_v20 = vld [vmem:[%s2108_s3 + $0x40] sm:$0xff]  ;;  %v56_v31 = vld [vmem:[%s2109_s0 + $0x108] sm:$0xff]  ;;  %v57_v34 = vld [vmem:[%s2109_s0 + $0x110] sm:$0xff]  ;;  %v96_v43 = vmul.f32 %v1290_v11, %v25_v32 }
   0x8   :  { %v1196_v24 = vpack.c.bf16 %v302_v21, %v301_v20  ;;  %v305_v29 = vld [vmem:[%s2108_s3 + $0x60] sm:$0xff]  ;;  %v26_v35 = vld [vmem:[%s2109_s0 + $0x18] sm:$0xff]  ;;  %v127_v38 = vmul.f32 %v1290_v11, %v56_v31  ;;  %v307_v41 = vld [vmem:[%s2108_s3 + $0x70] sm:$0xff]  ;;  %v128_v45 = vmul.f32 %v1290_v11, %v57_v34  ;;  %v1365_v48 = vadd.f32 %v1299_v14, %v95_v33 }
   0x9   :  { %1187 = vmatpush3.bf16.msra.mxu0 %v1184_v5  ;;  %1221 = vmatpush3.bf16.msra.mxu1 %v1184_v5  ;;  %v197_v19 = vadd.f32 %v1299_v14, %v126_v16  ;;  %v229_v22 = vmax.f32 %v165_v17, 0.0  ;;  %v58_v36 = vld [vmem:[%s2109_s0 + $0x118] sm:$0xff]  ;;  %v1204_v37 = vpack.c.bf16 %v306_v30, %v305_v29  ;;  %v27_v39 = vld [vmem:[%s2109_s0 + $0x20] sm:$0xff]  ;;  %v28_v44 = vld [vmem:[%s2109_s0 + $0x28] sm:$0xff]  ;;  %v97_v46 = vmul.f32 %v1290_v11, %v26_v35 }
   0xa   :  { %1189 = vmatprep.subr.bf16.mxu0 %v1188_v8  ;;  %1214 = vmatprep.subr.bf16.mxu1 %v1188_v8  ;;  %v59_v40 = vld [vmem:[%s2109_s0 + $0x120] sm:$0xff]  ;;  %v308_v42 = vld [vmem:[%s2108_s3 + $0x78] sm:$0xff]  ;;  %v129_v47 = vmul.f32 %v1290_v11, %v58_v36  ;;  %v98_v49 = vmul.f32 %v1290_v11, %v27_v39  ;;  %v60_v51 = vld [vmem:[%s2109_s0 + $0x128] sm:$0xff]  ;;  %v198_v53 = vadd.f32 %v1299_v14, %v127_v38  ;;  %v230_v2 = vmax.f32 %v1365_v48, 0.0 }
   0xb   :  { %v261_v23 = vmax.f32 %v197_v19, 0.0  ;;  %1084 = vmatprep.mubr.f32.mxu0 %v229_v22  ;;  %v130_v50 = vmul.f32 %v1290_v11, %v59_v40  ;;  %v1208_v52 = vpack.c.bf16 %v308_v42, %v307_v41  ;;  %v99_v54 = vmul.f32 %v1290_v11, %v28_v44  ;;  %v29_v55 = vld [vmem:[%s2109_s0 + $0x30] sm:$0xff]  ;;  %v30_v58 = vld [vmem:[%s2109_s0 + $0x38] sm:$0xff]  ;;  %v31_v0 = vld [vmem:[%s2109_s0 + $0x40] sm:$0xff] }
   0xc   :  { %v167_v56 = vadd.f32 %v1299_v14, %v96_v43  ;;  %v61_v57 = vld [vmem:[%s2109_s0 + $0x130] sm:$0xff]  ;;  %v199_v59 = vadd.f32 %v1299_v14, %v128_v45  ;;  %v1386_v60 = vadd.f32 %v1299_v14, %v97_v46  ;;  %v1389_v61 = vadd.f32 %v1299_v14, %v129_v47  ;;  %v62_v63 = vld [vmem:[%s2109_s0 + $0x138] sm:$0xff]  ;;  %v63_v1 = vld [vmem:[%s2109_s0 + $0x140] sm:$0xff] }
   0xd   :  { %1191 = vmatpush3.bf16.msra.mxu0 %v1188_v8  ;;  %1222 = vmatpush3.bf16.msra.mxu1 %v1188_v8  ;;  %v131_v62 = vmul.f32 %v1290_v11, %v60_v51  ;;  %v1403_v3 = vadd.f32 %v1299_v14, %v98_v49  ;;  %v1406_v4 = vadd.f32 %v1299_v14, %v130_v50  ;;  %v32_v6 = vld [vmem:[%s2109_s0 + $0x48] sm:$0xff]  ;;  %v262_v7 = vmax.f32 %v198_v53, 0.0  ;;  %v33_v22 = vld [vmem:[%s2109_s0 + $0x50] sm:$0xff]  ;;  %v34_v28 = vld [vmem:[%s2109_s0 + $0x58] sm:$0xff] }
   0xe   :  { %1193 = vmatprep.subr.bf16.mxu0 %v1192_v18  ;;  %1215 = vmatprep.subr.bf16.mxu1 %v1192_v18  ;;  %v100_v5 = vmul.f32 %v1290_v11, %v29_v55  ;;  %v1413_v8 = vadd.f32 %v1299_v14, %v99_v54  ;;  %v132_v9 = vmul.f32 %v1290_v11, %v61_v57  ;;  %v64_v12 = vld [vmem:[%s2109_s0 + $0x148] sm:$0xff]  ;;  %v231_v13 = vmax.f32 %v167_v56, 0.0  ;;  %v66_v33 = vld [vmem:[%s2109_s0 + $0x158] sm:$0xff]  ;;  %v35_v34 = vld [vmem:[%s2109_s0 + $0x60] sm:$0xff] }
   0xf   :  { %1132 = vmatprep.mubr.f32.mxu1 %v261_v23  ;;  %v101_v10 = vmul.f32 %v1290_v11, %v30_v58  ;;  %v133_v15 = vmul.f32 %v1290_v11, %v62_v63  ;;  %v102_v16 = vmul.f32 %v1290_v11, %v31_v0  ;;  %v134_v17 = vmul.f32 %v1290_v11, %v63_v1  ;;  %v67_v39 = vld [vmem:[%s2109_s0 + $0x160] sm:$0xff]  ;;  %v36_v40 = vld [vmem:[%s2109_s0 + $0x68] sm:$0xff]  ;;  %v46_v54 = vld [vmem:[%s2109_s0 + $0xb8] sm:$0xff] }
  0x10   :  { %v232_v19 = vmax.f32 %v1386_v60, 0.0  ;;  %v1425_v20 = vadd.f32 %v1299_v14, %v131_v62  ;;  %v103_v21 = vmul.f32 %v1290_v11, %v32_v6  ;;  %v264_v23 = vmax.f32 %v1389_v61, 0.0  ;;  %v68_v45 = vld [vmem:[%s2109_s0 + $0x168] sm:$0xff]  ;;  %v78_v60 = vld [vmem:[%s2109_s0 + $0x1b8] sm:$0xff]  ;;  %v69_v1 = vld [vmem:[%s2109_s0 + $0x170] sm:$0xff] }
  0x11   :  { %1195 = vmatpush3.bf16.msra.mxu0 %v1192_v18  ;;  %1223 = vmatpush3.bf16.msra.mxu1 %v1192_v18  ;;  %v263_v18 = vmax.f32 %v199_v59, 0.0  ;;  %v1434_v25 = vadd.f32 %v1299_v14, %v100_v5  ;;  %v135_v26 = vmul.f32 %v1290_v11, %v64_v12  ;;  %v265_v29 = vmax.f32 %v1406_v4, 0.0  ;;  %v37_v59 = vld [vmem:[%s2109_s0 + $0x70] sm:$0xff] }
  0x12   :  { %1197 = vmatprep.subr.bf16.mxu0 %v1196_v24  ;;  %1216 = vmatprep.subr.bf16.mxu1 %v1196_v24  ;;  %v234_v30 = vmax.f32 %v1413_v8, 0.0  ;;  %v1446_v31 = vadd.f32 %v1299_v14, %v132_v9  ;;  %v1449_v32 = vadd.f32 %v1299_v14, %v101_v10  ;;  %v1458_v35 = vadd.f32 %v1299_v14, %v133_v15  ;;  %v48_v8 = vld [vmem:[%s2109_s0 + $0xc8] sm:$0xff] }
  0x13   :  { %v1461_v36 = vadd.f32 %v1299_v14, %v102_v16  ;;  %v104_v38 = vmul.f32 %v1290_v11, %v33_v22  ;;  %v266_v41 = vmax.f32 %v1425_v20, 0.0  ;;  %v1475_v42 = vadd.f32 %v1299_v14, %v103_v21  ;;  %v80_v15 = vld [vmem:[%s2109_s0 + $0x1c8] sm:$0xff]  ;;  %v49_v16 = vld [vmem:[%s2109_s0 + $0xd0] sm:$0xff] }
  0x14   :  { %v105_v44 = vmul.f32 %v1290_v11, %v34_v28  ;;  %v235_v46 = vmax.f32 %v1434_v25, 0.0  ;;  %v1484_v47 = vadd.f32 %v1299_v14, %v135_v26  ;;  %v137_v48 = vmul.f32 %v1290_v11, %v66_v33  ;;  %v81_v21 = vld [vmem:[%s2109_s0 + $0x1d0] sm:$0xff]  ;;  %v82_v33 = vld [vmem:[%s2109_s0 + $0x1d8] sm:$0xff] }
  0x15   :  { %1199 = vmatpush3.bf16.msra.mxu0 %v1196_v24  ;;  %1224 = vmatpush3.bf16.msra.mxu1 %v1196_v24  ;;  %v233_v24 = vmax.f32 %v1403_v3, 0.0  ;;  %v106_v49 = vmul.f32 %v1290_v11, %v35_v34  ;;  %v267_v50 = vmax.f32 %v1446_v31, 0.0  ;;  %v236_v51 = vmax.f32 %v1449_v32, 0.0  ;;  %v84_v32 = vld [vmem:[%s2109_s0 + $0x1e8] sm:$0xff] }
  0x16   :  { %1201 = vmatprep.subr.bf16.mxu0 %v1200_v27  ;;  %1217 = vmatprep.subr.bf16.mxu1 %v1200_v27  ;;  %v107_v53 = vmul.f32 %v1290_v11, %v36_v40  ;;  %v268_v55 = vmax.f32 %v1458_v35, 0.0  ;;  %v237_v56 = vmax.f32 %v1461_v36, 0.0  ;;  %v1498_v57 = vadd.f32 %v1299_v14, %v104_v38  ;;  %v70_v35 = vld [vmem:[%s2109_s0 + $0x178] sm:$0xff]  ;;  %v51_v40 = vld [vmem:[%s2109_s0 + $0xe0] sm:$0xff] }
  0x17   :  { %v139_v58 = vmul.f32 %v1290_v11, %v68_v45  ;;  %v238_v62 = vmax.f32 %v1475_v42, 0.0  ;;  %v1513_v0 = vadd.f32 %v1299_v14, %v105_v44  ;;  %v270_v3 = vmax.f32 %v1484_v47, 0.0 }
  0x18   :  { %v1523_v4 = vadd.f32 %v1299_v14, %v137_v48  ;;  %v1526_v5 = vadd.f32 %v1299_v14, %v106_v49  ;;  %v117_v6 = vmul.f32 %v1290_v11, %v46_v54  ;;  %v1539_v10 = vadd.f32 %v1299_v14, %v107_v53  ;;  %v83_v48 = vld [vmem:[%s2109_s0 + $0x1e0] sm:$0xff]  ;;  %v52_v49 = vld [vmem:[%s2109_s0 + $0xe8] sm:$0xff] }
  0x19   :  { %1203 = vmatpush3.bf16.msra.mxu0 %v1200_v27  ;;  %1225 = vmatpush3.bf16.msra.mxu1 %v1200_v27  ;;  %v65_v27 = vld [vmem:[%s2109_s0 + $0x150] sm:$0xff]  ;;  %v108_v12 = vmul.f32 %v1290_v11, %v37_v59  ;;  %v239_v22 = vmax.f32 %v1498_v57, 0.0  ;;  %v119_v26 = vmul.f32 %v1290_v11, %v48_v8  ;;  %v120_v31 = vmul.f32 %v1290_v11, %v49_v16  ;;  %v71_v53 = vld [vmem:[%s2109_s0 + $0x180] sm:$0xff]  ;;  %v86_v8 = vld [vmem:[%s2109_s0 + $0x1f8] sm:$0xff] }
  0x1a   :  { %1205 = vmatprep.subr.bf16.mxu0 %v1204_v37  ;;  %1218 = vmatprep.subr.bf16.mxu1 %v1204_v37  ;;  %v136_v43 = vmul.f32 %v1290_v11, %v65_v27  ;;  %v50_v27 = vld [vmem:[%s2109_s0 + $0xd8] sm:$0xff]  ;;  %v153_v57 = vmul.f32 %v1290_v11, %v82_v33  ;;  %v154_v36 = vmul.f32 %v1290_v11, %v83_v48  ;;  %v75_v48 = vld [vmem:[%s2109_s0 + $0x1a0] sm:$0xff] }
  0x1b   :  { %v1582_v34 = vadd.f32 %v1299_v14, %v108_v12  ;;  %v1591_v38 = vadd.f32 %v1299_v14, %v119_v26  ;;  %v1605_v45 = vadd.f32 %v1299_v14, %v120_v31  ;;  %v241_v12 = vmax.f32 %v1526_v5, 0.0  ;;  %v42_v33 = vld [vmem:[%s2109_s0 + $0x98] sm:$0xff] }
  0x1c   :  { %v1510_v63 = vadd.f32 %v1299_v14, %v136_v43  ;;  %v39_v43 = vld [vmem:[%s2109_s0 + $0x80] sm:$0xff]  ;;  %v1674_v16 = vadd.f32 %v1299_v14, %v154_v36  ;;  %v44_v36 = vld [vmem:[%s2109_s0 + $0xa8] sm:$0xff] }
  0x1d   :  { %1207 = vmatpush3.bf16.msra.mxu0 %v1204_v37  ;;  %1226 = vmatpush3.bf16.msra.mxu1 %v1204_v37  ;;  %v1464_v37 = vadd.f32 %v1299_v14, %v134_v17  ;;  %v1550_v17 = vadd.f32 %v1299_v14, %v139_v58  ;;  %v141_v58 = vmul.f32 %v1290_v11, %v70_v35  ;;  %v74_v35 = vld [vmem:[%s2109_s0 + $0x198] sm:$0xff] }
  0x1e   :  { %1209 = vmatprep.subr.bf16.mxu0 %v1208_v52  ;;  %1219 = vmatprep.subr.bf16.mxu1 %v1208_v52  ;;  %v271_v28 = vmax.f32 %v1510_v63, 0.0  ;;  %v85_v63 = vld [vmem:[%s2109_s0 + $0x1f0] sm:$0xff] }
  0x1f   :  { %v269_v61 = vmax.f32 %v1464_v37, 0.0  ;;  %v156_v42 = vmul.f32 %v1290_v11, %v85_v63 }
  0x21   :  { %1211 = vmatpush3.bf16.msra.mxu0 %v1208_v52  ;;  %1227 = vmatpush3.bf16.msra.mxu1 %v1208_v52  ;;  %v138_v52 = vmul.f32 %v1290_v11, %v67_v39  ;;  %v152_v39 = vmul.f32 %v1290_v11, %v81_v21  ;;  %v242_v21 = vmax.f32 %v1539_v10, 0.0  ;;  %v243_v10 = vmax.f32 %v1582_v34, 0.0 }
  0x23   :  { %v1536_v9 = vadd.f32 %v1299_v14, %v138_v52  ;;  %v1624_v54 = vadd.f32 %v1299_v14, %v152_v39 }
  0x24   :  { %1085 = vmatmul.mubr.f32.vlgmr.msra.gmra.mrb[0].mxu0 %v230_v2  ;;  %1133 = vmatmul.mubr.f32.vlgmr.msra.gmra.mrb[0].mxu1 %v262_v7  ;;  %v47_v2 = vld [vmem:[%s2109_s0 + $0xc0] sm:$0xff] }
  0x25   :  { %1087 = vmatprep.mubr.f32.mxu0 %v231_v13  ;;  %1135 = vmatprep.mubr.f32.mxu1 %v263_v18  ;;  %v79_v7 = vld [vmem:[%s2109_s0 + $0x1c0] sm:$0xff]  ;;  %v149_v13 = vmul.f32 %v1290_v11, %v78_v60  ;;  %v140_v18 = vmul.f32 %v1290_v11, %v69_v1  ;;  %v118_v20 = vmul.f32 %v1290_v11, %v47_v2  ;;  %v273_v47 = vmax.f32 %v1536_v9, 0.0  ;;  %v73_v9 = vld [vmem:[%s2109_s0 + $0x190] sm:$0xff] }
  0x26   :  { %v150_v25 = vmul.f32 %v1290_v11, %v79_v7  ;;  %v122_v60 = vmul.f32 %v1290_v11, %v51_v40  ;;  %v1646_v1 = vadd.f32 %v1299_v14, %v153_v57  ;;  %v142_v2 = vmul.f32 %v1290_v11, %v71_v53 }
  0x27   :  { %v1618_v52 = vadd.f32 %v1299_v14, %v140_v18  ;;  %v145_v53 = vmul.f32 %v1290_v11, %v74_v35 }
  0x28   :  { %1088 = vmatmul.mubr.f32.gmra.mrb[2].mxu0 %v232_v19  ;;  %1136 = vmatmul.mubr.f32.gmra.mrb[2].mxu1 %v264_v23  ;;  %v1554_v19 = vadd.f32 %v1299_v14, %v117_v6  ;;  %v38_v23 = vld [vmem:[%s2109_s0 + $0x78] sm:$0xff]  ;;  %v1588_v37 = vadd.f32 %v1299_v14, %v150_v25  ;;  %v155_v6 = vmul.f32 %v1290_v11, %v84_v32 }
  0x29   :  { %1090 = vmatprep.mubr.f32.mxu0 %v233_v24  ;;  %1138 = vmatprep.mubr.f32.mxu1 %v265_v29  ;;  %v1565_v24 = vadd.f32 %v1299_v14, %v149_v13  ;;  %v1574_v29 = vadd.f32 %v1299_v14, %v118_v20  ;;  %v40_v13 = vld [vmem:[%s2109_s0 + $0x88] sm:$0xff]  ;;  %v157_v25 = vmul.f32 %v1290_v11, %v86_v8  ;;  %v275_v40 = vmax.f32 %v1618_v52, 0.0 }
  0x2a   :  { %v113_v52 = vmul.f32 %v1290_v11, %v42_v33 }
  0x2b   :  { %v1716_v39 = vadd.f32 %v1299_v14, %v157_v25 }
  0x2c   :  { %1091 = vmatmul.mubr.f32.gmra.mrb[4].mxu0 %v234_v30  ;;  %1139 = vmatmul.mubr.f32.gmra.mrb[4].mxu1 %v266_v41  ;;  %v151_v30 = vmul.f32 %v1290_v11, %v80_v15  ;;  %v109_v41 = vmul.f32 %v1290_v11, %v38_v23  ;;  %v72_v15 = vld [vmem:[%s2109_s0 + $0x188] sm:$0xff]  ;;  %v274_v23 = vmax.f32 %v1550_v17, 0.0  ;;  %v212_v17 = vadd.f32 %v1299_v14, %v141_v58 }
  0x2d   :  { %1093 = vmatprep.mubr.f32.mxu0 %v235_v46  ;;  %1141 = vmatprep.mubr.f32.mxu1 %v267_v50  ;;  %v121_v46 = vmul.f32 %v1290_v11, %v50_v27  ;;  %v240_v50 = vmax.f32 %v1513_v0, 0.0  ;;  %v110_v0 = vmul.f32 %v1290_v11, %v39_v43  ;;  %v111_v27 = vmul.f32 %v1290_v11, %v40_v13 }
  0x2e   :  { %v1602_v44 = vadd.f32 %v1299_v14, %v151_v30  ;;  %v180_v26 = vadd.f32 %v1299_v14, %v109_v41  ;;  %v213_v41 = vadd.f32 %v1299_v14, %v142_v2  ;;  %v144_v43 = vmul.f32 %v1290_v11, %v73_v9  ;;  %v77_v2 = vld [vmem:[%s2109_s0 + $0x1b0] sm:$0xff] }
  0x2f   :  { %v1638_v59 = vadd.f32 %v1299_v14, %v121_v46  ;;  %v181_v34 = vadd.f32 %v1299_v14, %v110_v0  ;;  %v43_v46 = vld [vmem:[%s2109_s0 + $0xa0] sm:$0xff]  ;;  %v276_v32 = vmax.f32 %v212_v17, 0.0  ;;  %v146_v0 = vmul.f32 %v1290_v11, %v75_v48 }
  0x30   :  { %1094 = vmatmul.mubr.f32.gmra.mrb[6].mxu0 %v236_v51  ;;  %1142 = vmatmul.mubr.f32.gmra.mrb[6].mxu1 %v268_v55  ;;  %v53_v51 = vld [vmem:[%s2109_s0 + $0xf0] sm:$0xff]  ;;  %v272_v55 = vmax.f32 %v1523_v4, 0.0  ;;  %v1655_v4 = vadd.f32 %v1299_v14, %v122_v60  ;;  %v244_v57 = vmax.f32 %v180_v26, 0.0  ;;  %v277_v60 = vmax.f32 %v213_v41, 0.0 }
  0x31   :  { %1096 = vmatprep.mubr.f32.mxu0 %v237_v56  ;;  %1144 = vmatprep.mubr.f32.mxu1 %v269_v61  ;;  %v123_v56 = vmul.f32 %v1290_v11, %v52_v49  ;;  %v54_v61 = vld [vmem:[%s2109_s0 + $0xf8] sm:$0xff]  ;;  %v124_v7 = vmul.f32 %v1290_v11, %v53_v51  ;;  %v182_v49 = vadd.f32 %v1299_v14, %v111_v27  ;;  %v245_v58 = vmax.f32 %v181_v34, 0.0 }
  0x32   :  { %v125_v20 = vmul.f32 %v1290_v11, %v54_v61  ;;  %v215_v63 = vadd.f32 %v1299_v14, %v144_v43  ;;  %v45_v61 = vld [vmem:[%s2109_s0 + $0xb0] sm:$0xff]  ;;  %v184_v8 = vadd.f32 %v1299_v14, %v113_v52  ;;  %v252_v34 = vmax.f32 %v1554_v19, 0.0 }
  0x33   :  { %v1677_v18 = vadd.f32 %v1299_v14, %v123_v56  ;;  %v1688_v5 = vadd.f32 %v1299_v14, %v124_v7  ;;  %v76_v56 = vld [vmem:[%s2109_s0 + $0x1a8] sm:$0xff]  ;;  %v284_v41 = vmax.f32 %v1565_v24, 0.0  ;;  %v253_v43 = vmax.f32 %v1574_v29, 0.0 }
  0x34   :  { %1097 = vmatmul.mubr.f32.gmra.mrb[8].mxu0 %v238_v62  ;;  %1145 = vmatmul.mubr.f32.gmra.mrb[8].mxu1 %v270_v3  ;;  %v41_v62 = vld [vmem:[%s2109_s0 + $0x90] sm:$0xff]  ;;  %v1685_v3 = vadd.f32 %v1299_v14, %v155_v6  ;;  %v1704_v30 = vadd.f32 %v1299_v14, %v125_v20  ;;  %v246_v6 = vmax.f32 %v182_v49, 0.0  ;;  %v217_v20 = vadd.f32 %v1299_v14, %v146_v0 }
  0x35   :  { %1099 = vmatprep.mubr.f32.mxu0 %v239_v22  ;;  %1147 = vmatprep.mubr.f32.mxu1 %v271_v28  ;;  %v1697_v22 = vadd.f32 %v1299_v14, %v156_v42  ;;  %v143_v28 = vmul.f32 %v1290_v11, %v72_v15  ;;  %v112_v31 = vmul.f32 %v1290_v11, %v41_v62  ;;  %v279_v62 = vmax.f32 %v215_v63, 0.0 }
  0x36   :  { %v115_v42 = vmul.f32 %v1290_v11, %v44_v36  ;;  %v248_v9 = vmax.f32 %v184_v8, 0.0  ;;  %v286_v48 = vmax.f32 %v1602_v44, 0.0  ;;  %v255_v49 = vmax.f32 %v1605_v45, 0.0 }
  0x37   :  { %v183_v51 = vadd.f32 %v1299_v14, %v112_v31  ;;  %v287_v19 = vmax.f32 %v1624_v54, 0.0  ;;  %v256_v24 = vmax.f32 %v1638_v59, 0.0  ;;  %v288_v29 = vmax.f32 %v1646_v1, 0.0 }
  0x38   :  { %1100 = vmatmul.mubr.f32.gmra.mrb[10].mxu0 %v240_v50  ;;  %1148 = vmatmul.mubr.f32.gmra.mrb[10].mxu1 %v272_v55  ;;  %v214_v50 = vadd.f32 %v1299_v14, %v143_v28  ;;  %v114_v55 = vmul.f32 %v1290_v11, %v43_v46  ;;  %v186_v26 = vadd.f32 %v1299_v14, %v115_v42  ;;  %v254_v46 = vmax.f32 %v1591_v38, 0.0 }
  0x39   :  { %1102 = vmatprep.mubr.f32.mxu0 %v241_v12  ;;  %1150 = vmatprep.mubr.f32.mxu1 %v273_v47  ;;  %v216_v12 = vadd.f32 %v1299_v14, %v145_v53  ;;  %v247_v13 = vmax.f32 %v183_v51, 0.0  ;;  %v147_v47 = vmul.f32 %v1290_v11, %v76_v56  ;;  %v289_v38 = vmax.f32 %v1674_v16, 0.0  ;;  %v1781_v16 = vld [vmem:[%s2112_s4] ss:$0 sm:$0xff] }
  0x3a   :  { %v278_v7 = vmax.f32 %v214_v50, 0.0  ;;  %v185_v15 = vadd.f32 %v1299_v14, %v114_v55  ;;  %v250_v33 = vmax.f32 %v186_v26, 0.0  ;;  %v258_v44 = vmax.f32 %v1677_v18, 0.0 }
  0x3b   :  { %v280_v25 = vmax.f32 %v216_v12, 0.0  ;;  %v218_v27 = vadd.f32 %v1299_v14, %v147_v47  ;;  %v290_v45 = vmax.f32 %v1685_v3, 0.0  ;;  %v259_v54 = vmax.f32 %v1688_v5, 0.0  ;;  %v1786_v3 = vld [vmem:[%s2113_s5] ss:$0 sm:$0xff] }
  0x3c   :  { %1103 = vmatmul.mubr.f32.gmra.mrb[12].mxu0 %v242_v21  ;;  %1151 = vmatmul.mubr.f32.gmra.mrb[12].mxu1 %v274_v23  ;;  %v116_v21 = vmul.f32 %v1290_v11, %v45_v61  ;;  %v148_v23 = vmul.f32 %v1290_v11, %v77_v2  ;;  %v249_v28 = vmax.f32 %v185_v15, 0.0  ;;  %v291_v59 = vmax.f32 %v1697_v22, 0.0 }
  0x3d   :  { %1105 = vmatprep.mubr.f32.mxu0 %v243_v10  ;;  %1153 = vmatprep.mubr.f32.mxu1 %v275_v40  ;;  %v281_v10 = vmax.f32 %v217_v20, 0.0  ;;  %v282_v11 = vmax.f32 %v218_v27, 0.0  ;;  %v260_v1 = vmax.f32 %v1704_v30, 0.0 }
  0x3e   :  { %v187_v17 = vadd.f32 %v1299_v14, %v116_v21  ;;  %v219_v31 = vadd.f32 %v1299_v14, %v148_v23  ;;  %v285_v14 = vmax.f32 %v1588_v37, 0.0  ;;  %v257_v37 = vmax.f32 %v1655_v4, 0.0 }
  0x3f   :  { %v292_v4 = vmax.f32 %v1716_v39, 0.0 }
  0x40   :  { %1106 = vmatmul.mubr.f32.gmra.mrb[14].mxu0 %v244_v57  ;;  %1154 = vmatmul.mubr.f32.gmra.mrb[14].mxu1 %v276_v32  ;;  %v251_v35 = vmax.f32 %v187_v17, 0.0  ;;  %v283_v40 = vmax.f32 %v219_v31, 0.0 }
  0x41   :  { %1108 = vmatprep.mubr.f32.mxu0 %v245_v58  ;;  %1156 = vmatprep.mubr.f32.mxu1 %v277_v60 }
  0x44   :  { %1109 = vmatmul.mubr.f32.gmra.mrb[16].mxu0 %v246_v6  ;;  %1157 = vmatmul.mubr.f32.gmra.mrb[16].mxu1 %v278_v7 }
  0x45   :  { %1111 = vmatprep.mubr.f32.mxu0 %v247_v13  ;;  %1159 = vmatprep.mubr.f32.mxu1 %v279_v62 }
  0x48   :  { %1112 = vmatmul.mubr.f32.gmra.mrb[18].mxu0 %v248_v9  ;;  %1160 = vmatmul.mubr.f32.gmra.mrb[18].mxu1 %v280_v25 }
  0x49   :  { %1114 = vmatprep.mubr.f32.mxu0 %v249_v28  ;;  %1162 = vmatprep.mubr.f32.mxu1 %v281_v10 }
  0x4c   :  { %1115 = vmatmul.mubr.f32.gmra.mrb[20].mxu0 %v250_v33  ;;  %1163 = vmatmul.mubr.f32.gmra.mrb[20].mxu1 %v282_v11 }
  0x4d   :  { %1117 = vmatprep.mubr.f32.mxu0 %v251_v35  ;;  %1165 = vmatprep.mubr.f32.mxu1 %v283_v40 }
  0x50   :  { %1118 = vmatmul.mubr.f32.gmra.mrb[22].mxu0 %v252_v34  ;;  %1166 = vmatmul.mubr.f32.gmra.mrb[22].mxu1 %v284_v41 }
  0x51   :  { %1120 = vmatprep.mubr.f32.mxu0 %v253_v43  ;;  %1168 = vmatprep.mubr.f32.mxu1 %v285_v14 }
  0x54   :  { %1121 = vmatmul.mubr.f32.gmra.mrb[24].mxu0 %v254_v46  ;;  %1169 = vmatmul.mubr.f32.gmra.mrb[24].mxu1 %v286_v48 }
  0x55   :  { %1123 = vmatprep.mubr.f32.mxu0 %v255_v49  ;;  %1171 = vmatprep.mubr.f32.mxu1 %v287_v19 }
  0x58   :  { %1124 = vmatmul.mubr.f32.gmra.mrb[26].mxu0 %v256_v24  ;;  %1172 = vmatmul.mubr.f32.gmra.mrb[26].mxu1 %v288_v29 }
  0x59   :  { %1126 = vmatprep.mubr.f32.mxu0 %v257_v37  ;;  %1174 = vmatprep.mubr.f32.mxu1 %v289_v38 }
  0x5c   :  { %1127 = vmatmul.mubr.f32.gmra.mrb[28].mxu0 %v258_v44  ;;  %1175 = vmatmul.mubr.f32.gmra.mrb[28].mxu1 %v290_v45 }
  0x5d   :  { %1129 = vmatprep.mubr.f32.mxu0 %v259_v54  ;;  %1177 = vmatprep.mubr.f32.mxu1 %v291_v59 }
  0x60   :  { %1130 = vmatmul.mubr.f32.gmra.mrb[30].mxu0 %v260_v1  ;;  %1178 = vmatmul.mubr.f32.gmra.mrb[30].mxu1 %v292_v4 }
  0xf7   :  { %v1086_v18 = vpop.f32.mrb[0].mxu0  ;;  %v1134_v5 = vpop.f32.mrb[0].mxu1 }
  0xf8   :  { %v702_v22 = vmul.f32 %v1086_v18, %v1781_v16  ;;  %v734_v30 = vmul.f32 %v1134_v5, %v1781_v16  ;;  %v375_v39 = vpop.f32.mrb[1].mxu0  ;;  %v535_v50 = vpop.f32.mrb[1].mxu1 }
  0xf9   :  { %v701_v52 = vmul.f32 %v1781_v16, %v375_v39  ;;  %v733_v53 = vmul.f32 %v1781_v16, %v535_v50 }
  0xfa   :  { %v773_v57 = vadd.f32 %v1786_v3, %v702_v22  ;;  %v805_v32 = vadd.f32 %v1786_v3, %v734_v30 }
  0xfb   :  { %v772_v51 = vadd.f32 %v1786_v3, %v701_v52  ;;  %v804_v55 = vadd.f32 %v1786_v3, %v733_v53  ;;  %v1089_v58 = vpop.f32.mrb[2].mxu0  ;;  %v1137_v60 = vpop.f32.mrb[2].mxu1 }
  0xfc   :  { %v837_v63 = vmax.f32 %v773_v57, 0.0  ;;  %v869_v0 = vmax.f32 %v805_v32, 0.0  ;;  %v704_v36 = vmul.f32 %v1089_v58, %v1781_v16  ;;  %v736_v56 = vmul.f32 %v1137_v60, %v1781_v16  ;;  %v385_v61 = vpop.f32.mrb[3].mxu0  ;;  %v545_v2 = vpop.f32.mrb[3].mxu1 }
  0xfd   :  { %v836_v6 = vmax.f32 %v772_v51, 0.0  ;;  %v868_v7 = vmax.f32 %v804_v55, 0.0  ;;  %v703_v8 = vmul.f32 %v1781_v16, %v385_v61  ;;  %v735_v12 = vmul.f32 %v1781_v16, %v545_v2 }
  0xfe   :  { %901 = vst [vmem:[%s2114_s6 + $0x8] sm:$0xff] %v837_v63  ;;  %933 = vst [vmem:[%s2114_s6 + $0x108] sm:$0xff] %v869_v0  ;;  %v775_v13 = vadd.f32 %v1786_v3, %v704_v36  ;;  %v807_v15 = vadd.f32 %v1786_v3, %v736_v56 }
  0xff   :  { %900 = vst [vmem:[%s2114_s6] sm:$0xff] %v836_v6  ;;  %932 = vst [vmem:[%s2114_s6 + $0x100] sm:$0xff] %v868_v7  ;;  %v774_v42 = vadd.f32 %v1786_v3, %v703_v8  ;;  %v806_v47 = vadd.f32 %v1786_v3, %v735_v12  ;;  %v1092_v62 = vpop.f32.mrb[4].mxu0  ;;  %v1140_v20 = vpop.f32.mrb[4].mxu1 }
 0x100   :  { %v839_v21 = vmax.f32 %v775_v13, 0.0  ;;  %v871_v23 = vmax.f32 %v807_v15, 0.0  ;;  %v706_v9 = vmul.f32 %v1092_v62, %v1781_v16  ;;  %v738_v25 = vmul.f32 %v1140_v20, %v1781_v16  ;;  %v395_v26 = vpop.f32.mrb[5].mxu0  ;;  %v555_v27 = vpop.f32.mrb[5].mxu1 }
 0x101   :  { %v838_v28 = vmax.f32 %v774_v42, 0.0  ;;  %v870_v10 = vmax.f32 %v806_v47, 0.0  ;;  %v705_v17 = vmul.f32 %v1781_v16, %v395_v26  ;;  %v737_v31 = vmul.f32 %v1781_v16, %v555_v27 }
 0x102   :  { %903 = vst [vmem:[%s2114_s6 + $0x18] sm:$0xff] %v839_v21  ;;  %935 = vst [vmem:[%s2114_s6 + $0x118] sm:$0xff] %v871_v23  ;;  %v777_v33 = vadd.f32 %v1786_v3, %v706_v9  ;;  %v809_v11 = vadd.f32 %v1786_v3, %v738_v25 }
 0x103   :  { %902 = vst [vmem:[%s2114_s6 + $0x10] sm:$0xff] %v838_v28  ;;  %934 = vst [vmem:[%s2114_s6 + $0x110] sm:$0xff] %v870_v10  ;;  %v776_v35 = vadd.f32 %v1786_v3, %v705_v17  ;;  %v808_v40 = vadd.f32 %v1786_v3, %v737_v31  ;;  %v1095_v34 = vpop.f32.mrb[6].mxu0  ;;  %v1143_v41 = vpop.f32.mrb[6].mxu1 }
 0x104   :  { %v841_v43 = vmax.f32 %v777_v33, 0.0  ;;  %v873_v14 = vmax.f32 %v809_v11, 0.0  ;;  %v708_v46 = vmul.f32 %v1095_v34, %v1781_v16  ;;  %v740_v48 = vmul.f32 %v1143_v41, %v1781_v16  ;;  %v405_v49 = vpop.f32.mrb[7].mxu0  ;;  %v565_v19 = vpop.f32.mrb[7].mxu1 }
 0x105   :  { %v840_v24 = vmax.f32 %v776_v35, 0.0  ;;  %v872_v29 = vmax.f32 %v808_v40, 0.0  ;;  %v707_v37 = vmul.f32 %v1781_v16, %v405_v49  ;;  %v739_v38 = vmul.f32 %v1781_v16, %v565_v19 }
 0x106   :  { %905 = vst [vmem:[%s2114_s6 + $0x28] sm:$0xff] %v841_v43  ;;  %937 = vst [vmem:[%s2114_s6 + $0x128] sm:$0xff] %v873_v14  ;;  %v779_v44 = vadd.f32 %v1786_v3, %v708_v46  ;;  %v811_v45 = vadd.f32 %v1786_v3, %v740_v48 }
 0x107   :  { %904 = vst [vmem:[%s2114_s6 + $0x20] sm:$0xff] %v840_v24  ;;  %936 = vst [vmem:[%s2114_s6 + $0x120] sm:$0xff] %v872_v29  ;;  %v778_v54 = vadd.f32 %v1786_v3, %v707_v37  ;;  %v810_v59 = vadd.f32 %v1786_v3, %v739_v38  ;;  %v1098_v1 = vpop.f32.mrb[8].mxu0  ;;  %v1146_v4 = vpop.f32.mrb[8].mxu1 }
 0x108   :  { %v843_v18 = vmax.f32 %v779_v44, 0.0  ;;  %v875_v5 = vmax.f32 %v811_v45, 0.0  ;;  %v710_v22 = vmul.f32 %v1098_v1, %v1781_v16  ;;  %v742_v30 = vmul.f32 %v1146_v4, %v1781_v16  ;;  %v415_v39 = vpop.f32.mrb[9].mxu0  ;;  %v575_v50 = vpop.f32.mrb[9].mxu1 }
 0x109   :  { %v842_v52 = vmax.f32 %v778_v54, 0.0  ;;  %v874_v53 = vmax.f32 %v810_v59, 0.0  ;;  %v709_v57 = vmul.f32 %v1781_v16, %v415_v39  ;;  %v741_v32 = vmul.f32 %v1781_v16, %v575_v50 }
 0x10a   :  { %907 = vst [vmem:[%s2114_s6 + $0x38] sm:$0xff] %v843_v18  ;;  %939 = vst [vmem:[%s2114_s6 + $0x138] sm:$0xff] %v875_v5  ;;  %v781_v51 = vadd.f32 %v1786_v3, %v710_v22  ;;  %v813_v55 = vadd.f32 %v1786_v3, %v742_v30 }
 0x10b   :  { %906 = vst [vmem:[%s2114_s6 + $0x30] sm:$0xff] %v842_v52  ;;  %938 = vst [vmem:[%s2114_s6 + $0x130] sm:$0xff] %v874_v53  ;;  %v780_v58 = vadd.f32 %v1786_v3, %v709_v57  ;;  %v812_v60 = vadd.f32 %v1786_v3, %v741_v32  ;;  %v1101_v63 = vpop.f32.mrb[10].mxu0  ;;  %v1149_v0 = vpop.f32.mrb[10].mxu1 }
 0x10c   :  { %v845_v36 = vmax.f32 %v781_v51, 0.0  ;;  %v877_v56 = vmax.f32 %v813_v55, 0.0  ;;  %v712_v61 = vmul.f32 %v1101_v63, %v1781_v16  ;;  %v744_v2 = vmul.f32 %v1149_v0, %v1781_v16  ;;  %v425_v6 = vpop.f32.mrb[11].mxu0  ;;  %v585_v7 = vpop.f32.mrb[11].mxu1 }
 0x10d   :  { %v844_v8 = vmax.f32 %v780_v58, 0.0  ;;  %v876_v12 = vmax.f32 %v812_v60, 0.0  ;;  %v711_v13 = vmul.f32 %v1781_v16, %v425_v6  ;;  %v743_v15 = vmul.f32 %v1781_v16, %v585_v7 }
 0x10e   :  { %909 = vst [vmem:[%s2114_s6 + $0x48] sm:$0xff] %v845_v36  ;;  %941 = vst [vmem:[%s2114_s6 + $0x148] sm:$0xff] %v877_v56  ;;  %v783_v42 = vadd.f32 %v1786_v3, %v712_v61  ;;  %v815_v47 = vadd.f32 %v1786_v3, %v744_v2 }
 0x10f   :  { %908 = vst [vmem:[%s2114_s6 + $0x40] sm:$0xff] %v844_v8  ;;  %940 = vst [vmem:[%s2114_s6 + $0x140] sm:$0xff] %v876_v12  ;;  %v782_v62 = vadd.f32 %v1786_v3, %v711_v13  ;;  %v814_v20 = vadd.f32 %v1786_v3, %v743_v15  ;;  %v1104_v21 = vpop.f32.mrb[12].mxu0  ;;  %v1152_v23 = vpop.f32.mrb[12].mxu1 }
 0x110   :  { %v847_v9 = vmax.f32 %v783_v42, 0.0  ;;  %v879_v25 = vmax.f32 %v815_v47, 0.0  ;;  %v714_v26 = vmul.f32 %v1104_v21, %v1781_v16  ;;  %v746_v27 = vmul.f32 %v1152_v23, %v1781_v16  ;;  %v435_v28 = vpop.f32.mrb[13].mxu0  ;;  %v595_v10 = vpop.f32.mrb[13].mxu1 }
 0x111   :  { %v846_v17 = vmax.f32 %v782_v62, 0.0  ;;  %v878_v31 = vmax.f32 %v814_v20, 0.0  ;;  %v713_v33 = vmul.f32 %v1781_v16, %v435_v28  ;;  %v745_v11 = vmul.f32 %v1781_v16, %v595_v10 }
 0x112   :  { %911 = vst [vmem:[%s2114_s6 + $0x58] sm:$0xff] %v847_v9  ;;  %943 = vst [vmem:[%s2114_s6 + $0x158] sm:$0xff] %v879_v25  ;;  %v785_v35 = vadd.f32 %v1786_v3, %v714_v26  ;;  %v817_v40 = vadd.f32 %v1786_v3, %v746_v27 }
 0x113   :  { %910 = vst [vmem:[%s2114_s6 + $0x50] sm:$0xff] %v846_v17  ;;  %942 = vst [vmem:[%s2114_s6 + $0x150] sm:$0xff] %v878_v31  ;;  %v784_v34 = vadd.f32 %v1786_v3, %v713_v33  ;;  %v816_v41 = vadd.f32 %v1786_v3, %v745_v11  ;;  %v1107_v43 = vpop.f32.mrb[14].mxu0  ;;  %v1155_v14 = vpop.f32.mrb[14].mxu1 }
 0x114   :  { %v849_v46 = vmax.f32 %v785_v35, 0.0  ;;  %v881_v48 = vmax.f32 %v817_v40, 0.0  ;;  %v716_v49 = vmul.f32 %v1107_v43, %v1781_v16  ;;  %v748_v19 = vmul.f32 %v1155_v14, %v1781_v16  ;;  %v445_v24 = vpop.f32.mrb[15].mxu0  ;;  %v605_v29 = vpop.f32.mrb[15].mxu1 }
 0x115   :  { %v848_v37 = vmax.f32 %v784_v34, 0.0  ;;  %v880_v38 = vmax.f32 %v816_v41, 0.0  ;;  %v715_v44 = vmul.f32 %v1781_v16, %v445_v24  ;;  %v747_v45 = vmul.f32 %v1781_v16, %v605_v29 }
 0x116   :  { %913 = vst [vmem:[%s2114_s6 + $0x68] sm:$0xff] %v849_v46  ;;  %945 = vst [vmem:[%s2114_s6 + $0x168] sm:$0xff] %v881_v48  ;;  %v787_v54 = vadd.f32 %v1786_v3, %v716_v49  ;;  %v819_v59 = vadd.f32 %v1786_v3, %v748_v19 }
 0x117   :  { %912 = vst [vmem:[%s2114_s6 + $0x60] sm:$0xff] %v848_v37  ;;  %944 = vst [vmem:[%s2114_s6 + $0x160] sm:$0xff] %v880_v38  ;;  %v786_v1 = vadd.f32 %v1786_v3, %v715_v44  ;;  %v818_v4 = vadd.f32 %v1786_v3, %v747_v45  ;;  %v1110_v18 = vpop.f32.mrb[16].mxu0  ;;  %v1158_v5 = vpop.f32.mrb[16].mxu1 }
 0x118   :  { %v851_v22 = vmax.f32 %v787_v54, 0.0  ;;  %v883_v30 = vmax.f32 %v819_v59, 0.0  ;;  %v718_v39 = vmul.f32 %v1110_v18, %v1781_v16  ;;  %v750_v50 = vmul.f32 %v1158_v5, %v1781_v16  ;;  %v455_v52 = vpop.f32.mrb[17].mxu0  ;;  %v615_v53 = vpop.f32.mrb[17].mxu1 }
 0x119   :  { %v850_v57 = vmax.f32 %v786_v1, 0.0  ;;  %v882_v32 = vmax.f32 %v818_v4, 0.0  ;;  %v717_v51 = vmul.f32 %v1781_v16, %v455_v52  ;;  %v749_v55 = vmul.f32 %v1781_v16, %v615_v53 }
 0x11a   :  { %915 = vst [vmem:[%s2114_s6 + $0x78] sm:$0xff] %v851_v22  ;;  %947 = vst [vmem:[%s2114_s6 + $0x178] sm:$0xff] %v883_v30  ;;  %v789_v58 = vadd.f32 %v1786_v3, %v718_v39  ;;  %v821_v60 = vadd.f32 %v1786_v3, %v750_v50 }
 0x11b   :  { %914 = vst [vmem:[%s2114_s6 + $0x70] sm:$0xff] %v850_v57  ;;  %946 = vst [vmem:[%s2114_s6 + $0x170] sm:$0xff] %v882_v32  ;;  %v788_v63 = vadd.f32 %v1786_v3, %v717_v51  ;;  %v820_v0 = vadd.f32 %v1786_v3, %v749_v55  ;;  %v1113_v36 = vpop.f32.mrb[18].mxu0  ;;  %v1161_v56 = vpop.f32.mrb[18].mxu1 }
 0x11c   :  { %v853_v61 = vmax.f32 %v789_v58, 0.0  ;;  %v885_v2 = vmax.f32 %v821_v60, 0.0  ;;  %v720_v6 = vmul.f32 %v1113_v36, %v1781_v16  ;;  %v752_v7 = vmul.f32 %v1161_v56, %v1781_v16  ;;  %v465_v8 = vpop.f32.mrb[19].mxu0  ;;  %v625_v12 = vpop.f32.mrb[19].mxu1 }
 0x11d   :  { %v852_v13 = vmax.f32 %v788_v63, 0.0  ;;  %v884_v15 = vmax.f32 %v820_v0, 0.0  ;;  %v719_v42 = vmul.f32 %v1781_v16, %v465_v8  ;;  %v751_v47 = vmul.f32 %v1781_v16, %v625_v12 }
 0x11e   :  { %917 = vst [vmem:[%s2114_s6 + $0x88] sm:$0xff] %v853_v61  ;;  %949 = vst [vmem:[%s2114_s6 + $0x188] sm:$0xff] %v885_v2  ;;  %v791_v62 = vadd.f32 %v1786_v3, %v720_v6  ;;  %v823_v20 = vadd.f32 %v1786_v3, %v752_v7 }
 0x11f   :  { %916 = vst [vmem:[%s2114_s6 + $0x80] sm:$0xff] %v852_v13  ;;  %948 = vst [vmem:[%s2114_s6 + $0x180] sm:$0xff] %v884_v15  ;;  %v790_v21 = vadd.f32 %v1786_v3, %v719_v42  ;;  %v822_v23 = vadd.f32 %v1786_v3, %v751_v47  ;;  %v1116_v9 = vpop.f32.mrb[20].mxu0  ;;  %v1164_v25 = vpop.f32.mrb[20].mxu1 }
 0x120   :  { %v855_v26 = vmax.f32 %v791_v62, 0.0  ;;  %v887_v27 = vmax.f32 %v823_v20, 0.0  ;;  %v722_v28 = vmul.f32 %v1116_v9, %v1781_v16  ;;  %v754_v10 = vmul.f32 %v1164_v25, %v1781_v16  ;;  %v475_v17 = vpop.f32.mrb[21].mxu0  ;;  %v635_v31 = vpop.f32.mrb[21].mxu1 }
 0x121   :  { %v854_v33 = vmax.f32 %v790_v21, 0.0  ;;  %v886_v11 = vmax.f32 %v822_v23, 0.0  ;;  %v721_v35 = vmul.f32 %v1781_v16, %v475_v17  ;;  %v753_v40 = vmul.f32 %v1781_v16, %v635_v31 }
 0x122   :  { %919 = vst [vmem:[%s2114_s6 + $0x98] sm:$0xff] %v855_v26  ;;  %951 = vst [vmem:[%s2114_s6 + $0x198] sm:$0xff] %v887_v27  ;;  %v793_v34 = vadd.f32 %v1786_v3, %v722_v28  ;;  %v825_v41 = vadd.f32 %v1786_v3, %v754_v10 }
 0x123   :  { %918 = vst [vmem:[%s2114_s6 + $0x90] sm:$0xff] %v854_v33  ;;  %950 = vst [vmem:[%s2114_s6 + $0x190] sm:$0xff] %v886_v11  ;;  %v792_v43 = vadd.f32 %v1786_v3, %v721_v35  ;;  %v824_v14 = vadd.f32 %v1786_v3, %v753_v40  ;;  %v1119_v46 = vpop.f32.mrb[22].mxu0  ;;  %v1167_v48 = vpop.f32.mrb[22].mxu1 }
 0x124   :  { %v857_v49 = vmax.f32 %v793_v34, 0.0  ;;  %v889_v19 = vmax.f32 %v825_v41, 0.0  ;;  %v724_v24 = vmul.f32 %v1119_v46, %v1781_v16  ;;  %v756_v29 = vmul.f32 %v1167_v48, %v1781_v16  ;;  %v485_v37 = vpop.f32.mrb[23].mxu0  ;;  %v645_v38 = vpop.f32.mrb[23].mxu1 }
 0x125   :  { %v856_v44 = vmax.f32 %v792_v43, 0.0  ;;  %v888_v45 = vmax.f32 %v824_v14, 0.0  ;;  %v723_v54 = vmul.f32 %v1781_v16, %v485_v37  ;;  %v755_v59 = vmul.f32 %v1781_v16, %v645_v38 }
 0x126   :  { %921 = vst [vmem:[%s2114_s6 + $0xa8] sm:$0xff] %v857_v49  ;;  %953 = vst [vmem:[%s2114_s6 + $0x1a8] sm:$0xff] %v889_v19  ;;  %v795_v1 = vadd.f32 %v1786_v3, %v724_v24  ;;  %v827_v4 = vadd.f32 %v1786_v3, %v756_v29 }
 0x127   :  { %920 = vst [vmem:[%s2114_s6 + $0xa0] sm:$0xff] %v856_v44  ;;  %952 = vst [vmem:[%s2114_s6 + $0x1a0] sm:$0xff] %v888_v45  ;;  %v794_v18 = vadd.f32 %v1786_v3, %v723_v54  ;;  %v826_v5 = vadd.f32 %v1786_v3, %v755_v59  ;;  %v1122_v22 = vpop.f32.mrb[24].mxu0  ;;  %v1170_v30 = vpop.f32.mrb[24].mxu1 }
 0x128   :  { %v859_v39 = vmax.f32 %v795_v1, 0.0  ;;  %v891_v50 = vmax.f32 %v827_v4, 0.0  ;;  %v726_v52 = vmul.f32 %v1122_v22, %v1781_v16  ;;  %v758_v53 = vmul.f32 %v1170_v30, %v1781_v16  ;;  %v495_v57 = vpop.f32.mrb[25].mxu0  ;;  %v655_v32 = vpop.f32.mrb[25].mxu1 }
 0x129   :  { %v858_v51 = vmax.f32 %v794_v18, 0.0  ;;  %v890_v55 = vmax.f32 %v826_v5, 0.0  ;;  %v725_v58 = vmul.f32 %v1781_v16, %v495_v57  ;;  %v757_v60 = vmul.f32 %v1781_v16, %v655_v32 }
 0x12a   :  { %923 = vst [vmem:[%s2114_s6 + $0xb8] sm:$0xff] %v859_v39  ;;  %955 = vst [vmem:[%s2114_s6 + $0x1b8] sm:$0xff] %v891_v50  ;;  %v797_v63 = vadd.f32 %v1786_v3, %v726_v52  ;;  %v829_v0 = vadd.f32 %v1786_v3, %v758_v53 }
 0x12b   :  { %922 = vst [vmem:[%s2114_s6 + $0xb0] sm:$0xff] %v858_v51  ;;  %954 = vst [vmem:[%s2114_s6 + $0x1b0] sm:$0xff] %v890_v55  ;;  %v796_v36 = vadd.f32 %v1786_v3, %v725_v58  ;;  %v828_v56 = vadd.f32 %v1786_v3, %v757_v60  ;;  %v1125_v61 = vpop.f32.mrb[26].mxu0  ;;  %v1173_v2 = vpop.f32.mrb[26].mxu1 }
 0x12c   :  { %v861_v6 = vmax.f32 %v797_v63, 0.0  ;;  %v893_v7 = vmax.f32 %v829_v0, 0.0  ;;  %v728_v8 = vmul.f32 %v1125_v61, %v1781_v16  ;;  %v760_v12 = vmul.f32 %v1173_v2, %v1781_v16  ;;  %v505_v13 = vpop.f32.mrb[27].mxu0  ;;  %v665_v15 = vpop.f32.mrb[27].mxu1 }
 0x12d   :  { %v860_v42 = vmax.f32 %v796_v36, 0.0  ;;  %v892_v47 = vmax.f32 %v828_v56, 0.0  ;;  %v727_v62 = vmul.f32 %v1781_v16, %v505_v13  ;;  %v759_v20 = vmul.f32 %v1781_v16, %v665_v15 }
 0x12e   :  { %925 = vst [vmem:[%s2114_s6 + $0xc8] sm:$0xff] %v861_v6  ;;  %957 = vst [vmem:[%s2114_s6 + $0x1c8] sm:$0xff] %v893_v7  ;;  %v799_v21 = vadd.f32 %v1786_v3, %v728_v8  ;;  %v831_v23 = vadd.f32 %v1786_v3, %v760_v12 }
 0x12f   :  { %924 = vst [vmem:[%s2114_s6 + $0xc0] sm:$0xff] %v860_v42  ;;  %956 = vst [vmem:[%s2114_s6 + $0x1c0] sm:$0xff] %v892_v47  ;;  %v798_v9 = vadd.f32 %v1786_v3, %v727_v62  ;;  %v830_v25 = vadd.f32 %v1786_v3, %v759_v20  ;;  %v1128_v26 = vpop.f32.mrb[28].mxu0  ;;  %v1176_v27 = vpop.f32.mrb[28].mxu1 }
 0x130   :  { %v863_v28 = vmax.f32 %v799_v21, 0.0  ;;  %v895_v10 = vmax.f32 %v831_v23, 0.0  ;;  %v730_v17 = vmul.f32 %v1128_v26, %v1781_v16  ;;  %v762_v31 = vmul.f32 %v1176_v27, %v1781_v16  ;;  %v515_v33 = vpop.f32.mrb[29].mxu0  ;;  %v675_v11 = vpop.f32.mrb[29].mxu1 }
 0x131   :  { %v862_v35 = vmax.f32 %v798_v9, 0.0  ;;  %v894_v40 = vmax.f32 %v830_v25, 0.0  ;;  %v729_v34 = vmul.f32 %v1781_v16, %v515_v33  ;;  %v761_v41 = vmul.f32 %v1781_v16, %v675_v11 }
 0x132   :  { %927 = vst [vmem:[%s2114_s6 + $0xd8] sm:$0xff] %v863_v28  ;;  %959 = vst [vmem:[%s2114_s6 + $0x1d8] sm:$0xff] %v895_v10  ;;  %v801_v43 = vadd.f32 %v1786_v3, %v730_v17  ;;  %v833_v14 = vadd.f32 %v1786_v3, %v762_v31 }
 0x133   :  { %926 = vst [vmem:[%s2114_s6 + $0xd0] sm:$0xff] %v862_v35  ;;  %958 = vst [vmem:[%s2114_s6 + $0x1d0] sm:$0xff] %v894_v40  ;;  %v800_v46 = vadd.f32 %v1786_v3, %v729_v34  ;;  %v832_v48 = vadd.f32 %v1786_v3, %v761_v41  ;;  %v1131_v49 = vpop.f32.mrb[30].mxu0  ;;  %v1179_v19 = vpop.f32.mrb[30].mxu1 }
 0x134   :  { %v865_v24 = vmax.f32 %v801_v43, 0.0  ;;  %v897_v29 = vmax.f32 %v833_v14, 0.0  ;;  %v732_v37 = vmul.f32 %v1131_v49, %v1781_v16  ;;  %v764_v38 = vmul.f32 %v1179_v19, %v1781_v16  ;;  %v525_v44 = vpop.f32.mrb[31].mxu0  ;;  %v685_v45 = vpop.f32.mrb[31].mxu1 }
 0x135   :  { %v864_v54 = vmax.f32 %v800_v46, 0.0  ;;  %v896_v59 = vmax.f32 %v832_v48, 0.0  ;;  %v731_v1 = vmul.f32 %v1781_v16, %v525_v44  ;;  %v763_v4 = vmul.f32 %v1781_v16, %v685_v45 }
 0x136   :  { %929 = vst [vmem:[%s2114_s6 + $0xe8] sm:$0xff] %v865_v24  ;;  %961 = vst [vmem:[%s2114_s6 + $0x1e8] sm:$0xff] %v897_v29  ;;  %v803_v18 = vadd.f32 %v1786_v3, %v732_v37  ;;  %v835_v5 = vadd.f32 %v1786_v3, %v764_v38 }
 0x137   :  { %928 = vst [vmem:[%s2114_s6 + $0xe0] sm:$0xff] %v864_v54  ;;  %960 = vst [vmem:[%s2114_s6 + $0x1e0] sm:$0xff] %v896_v59  ;;  %v802_v16 = vadd.f32 %v1786_v3, %v731_v1  ;;  %v834_v22 = vadd.f32 %v1786_v3, %v763_v4 }
 0x138   :  { %v867_v30 = vmax.f32 %v803_v18, 0.0  ;;  %v899_v39 = vmax.f32 %v835_v5, 0.0 }
 0x139   :  { %v866_v50 = vmax.f32 %v802_v16, 0.0  ;;  %v898_v52 = vmax.f32 %v834_v22, 0.0 }
 0x13a   :  { %931 = vst [vmem:[%s2114_s6 + $0xf8] sm:$0xff] %v867_v30  ;;  %963 = vst [vmem:[%s2114_s6 + $0x1f8] sm:$0xff] %v899_v39 }
 0x13b   :  { %930 = vst [vmem:[%s2114_s6 + $0xf0] sm:$0xff] %v866_v50  ;;  %962 = vst [vmem:[%s2114_s6 + $0x1f0] sm:$0xff] %v898_v52 }

// kernel: preact_bottleneck.3
= control target key start
LH: loop header
LB: loop body
LE: loop exit
PB: predicated region body
PF: predicated region fallthrough
CT: control target
= control target key end

     0   :  { %s3425_s30 = smov 0   ;;  %s4160_s0 = inlined_call_operand.vmem [shape: f32[2,4,9,9,128], index: 0, kind: input, shape index: {}]   ;;  %s4161_s1 = inlined_call_operand.vmem [shape: f32[9,128,128], index: 1, kind: input, shape index: {}]   ;;  %s4162_s2 = inlined_call_operand.vmem [shape: f32[1,128], index: 2, kind: input, shape index: {}]   ;;  %s4163_s3 = inlined_call_operand.vmem [shape: f32[1,128], index: 3, kind: input, shape index: {}]   ;;  %s4164_s4 = inlined_call_operand.vmem [shape: f32[128,128], index: 4, kind: input, shape index: {}]   ;;  %s4165_s5 = inlined_call_operand.vmem [shape: f32[2,64,128], index: 5, kind: input, shape index: {}]   ;;  %s4166_s6 = inlined_call_operand.vmem [shape: f32[1,128], index: 6, kind: input, shape index: {}]   ;;  %s4167_s7 = inlined_call_operand.vmem [shape: f32[1,128], index: 7, kind: input, shape index: {}]   ;;  %s4168_s8 = inlined_call_operand.vmem [shape: f32[128,128], index: 8, kind: input, shape index: {}]   ;;  %s4169_s9 = inlined_call_operand.vmem [shape: f32[2,64,128], index: 9, kind: output, shape index: {}]  }
   0x1 LB: > { %s1984_s10 = sadd.s32 4294967295, %s3373_s30   ;;  %p1988_p0 = scmp.ge.s32.totalorder %s3373_s30, 1  ;;  %s3373_s30 = sphi %s3425_s30, %s19_s30  }
   0x2   : > { %p297_p1 = scmp.lt.s32.totalorder %s3373_s30, 3 }
   0x4   : > { %p298_p2 = pnand %p1988_p0, %p297_p1 }
   0x5   : > { %v2042_v0 = vld [vmem:[%s4161_s1 + $0x180] sm:$0xff] (!%p298_p2)  ;;  %v2043_v1 = vld [vmem:[%s4161_s1 + $0x188] sm:$0xff] (!%p298_p2)  ;;  %v2044_v2 = vld [vmem:[%s4161_s1 + $0x190] sm:$0xff] (!%p298_p2)  ;;  %p338_p3 = scmp.lt.s32.totalorder (!%p298_p2), %s1984_s10, 1 }
   0x6   : > { %301 = sbr.rel (%p298_p2) target bundleno = 648 (0x288), region = 56  ;;  %v3030_v3 = vpack.c.bf16 (!%p298_p2), %v2043_v1, %v2042_v0  ;;  %v2045_v4 = vld [vmem:[%s4161_s1 + $0x198] sm:$0xff] (!%p298_p2)  ;;  %v2046_v6 = vld [vmem:[%s4161_s1 + $0x1a0] sm:$0xff] (!%p298_p2)  ;;  %v2047_v7 = vld [vmem:[%s4161_s1 + $0x1a8] sm:$0xff] (!%p298_p2) }
   0x7   : > { %v3034_v5 = vpack.c.bf16 (!%p298_p2), %v2045_v4, %v2044_v2  ;;  %v3038_v8 = vpack.c.bf16 (!%p298_p2), %v2047_v7, %v2046_v6  ;;  %v2002_v9 = vld [vmem:[%s4161_s1 + $0x80] sm:$0xff] (!%p298_p2)  ;;  %v2003_v10 = vld [vmem:[%s4161_s1 + $0x88] sm:$0xff] (!%p298_p2)  ;;  %v2048_v11 = vld [vmem:[%s4161_s1 + $0x1b0] sm:$0xff] (!%p298_p2) }
   0x8   : > { %3031 = vmatprep.subr.bf16.mxu0 (!%p298_p2), %v3030_v3  ;;  %v2049_v12 = vld [vmem:[%s4161_s1 + $0x1b8] sm:$0xff] (!%p298_p2)  ;;  %v2934_v13 = vpack.c.bf16 (!%p298_p2), %v2003_v10, %v2002_v9  ;;  %v2004_v14 = vld [vmem:[%s4161_s1 + $0x90] sm:$0xff] (!%p298_p2)  ;;  %v2006_v18 = vld [vmem:[%s4161_s1 + $0xa0] sm:$0xff] (!%p298_p2) }
   0x9   : > { %3033 = vmatpush3.bf16.msra.mxu0 (!%p298_p2), %v3030_v3  ;;  %v2005_v16 = vld [vmem:[%s4161_s1 + $0x98] sm:$0xff] (!%p298_p2)  ;;  %v3042_v19 = vpack.c.bf16 (!%p298_p2), %v2049_v12, %v2048_v11  ;;  %v2007_v20 = vld [vmem:[%s4161_s1 + $0xa8] sm:$0xff] (!%p298_p2)  ;;  %v2050_v21 = vld [vmem:[%s4161_s1 + $0x1c0] sm:$0xff] (!%p298_p2) }
   0xa   : > { %3035 = vmatprep.subr.bf16.mxu0 (!%p298_p2), %v3034_v5  ;;  %2935 = vmatprep.subr.bf16.mxu1 (!%p298_p2), %v2934_v13  ;;  %v2938_v17 = vpack.c.bf16 (!%p298_p2), %v2005_v16, %v2004_v14  ;;  %v2051_v22 = vld [vmem:[%s4161_s1 + $0x1c8] sm:$0xff] (!%p298_p2)  ;;  %v2942_v23 = vpack.c.bf16 (!%p298_p2), %v2007_v20, %v2006_v18  ;;  %v2008_v24 = vld [vmem:[%s4161_s1 + $0xb0] sm:$0xff] (!%p298_p2)  ;;  %v2009_v25 = vld [vmem:[%s4161_s1 + $0xb8] sm:$0xff] (!%p298_p2) }
   0xb   : > { %2937 = vmatpush3.bf16.msra.mxu1 (!%p298_p2), %v2934_v13  ;;  %v3046_v26 = vpack.c.bf16 (!%p298_p2), %v2051_v22, %v2050_v21  ;;  %v2052_v27 = vld [vmem:[%s4161_s1 + $0x1d0] sm:$0xff] (!%p298_p2)  ;;  %v2053_v28 = vld [vmem:[%s4161_s1 + $0x1d8] sm:$0xff] (!%p298_p2)  ;;  %v2946_v29 = vpack.c.bf16 (!%p298_p2), %v2009_v25, %v2008_v24  ;;  %v2010_v30 = vld [vmem:[%s4161_s1 + $0xc0] sm:$0xff] (!%p298_p2) }
   0xc   : > { %2939 = vmatprep.subr.bf16.mxu1 (!%p298_p2), %v2938_v17  ;;  %v2011_v31 = vld [vmem:[%s4161_s1 + $0xc8] sm:$0xff] (!%p298_p2)  ;;  %v3050_v32 = vpack.c.bf16 (!%p298_p2), %v2053_v28, %v2052_v27  ;;  %v2054_v33 = vld [vmem:[%s4161_s1 + $0x1e0] sm:$0xff] (!%p298_p2)  ;;  %v2012_v37 = vld [vmem:[%s4161_s1 + $0xd0] sm:$0xff] (!%p298_p2) }
   0xd   : > { %s4171_s10 = smov (!%p338_p3, %s1984_s10), 1  ;;  %3037 = vmatpush3.bf16.msra.mxu0 %v3034_v5  ;;  %v2055_v34 = vld [vmem:[%s4161_s1 + $0x1e8] sm:$0xff]  ;;  %v2950_v36 = vpack.c.bf16 %v2011_v31, %v2010_v30  ;;  %v2013_v38 = vld [vmem:[%s4161_s1 + $0xd8] sm:$0xff]  ;;  %v2056_v40 = vld [vmem:[%s4161_s1 + $0x1f0] sm:$0xff] }
   0xe   : > { %s3358_s23 = smul.u32 576, %s4171_s10  ;;  %3039 = vmatprep.subr.bf16.mxu0 %v3038_v8  ;;  %v3054_v39 = vpack.c.bf16 %v2055_v34, %v2054_v33  ;;  %v2057_v41 = vld [vmem:[%s4161_s1 + $0x1f8] sm:$0xff]  ;;  %v2954_v42 = vpack.c.bf16 %v2013_v38, %v2012_v37  ;;  %v2014_v43 = vld [vmem:[%s4161_s1 + $0xe0] sm:$0xff]  ;;  %v2015_v44 = vld [vmem:[%s4161_s1 + $0xe8] sm:$0xff]  ;;  %s2184_s16 = sshll.u32 %s4171_s10, 6 }
   0xf   : > { %2941 = vmatpush3.bf16.msra.mxu1 %v2938_v17  ;;  %v3058_v45 = vpack.c.bf16 %v2057_v41, %v2056_v40  ;;  %v2066_v46 = vld [vmem:[%s4161_s1 + $0x200] sm:$0xff]  ;;  %v2067_v47 = vld [vmem:[%s4161_s1 + $0x208] sm:$0xff]  ;;  %v2958_v48 = vpack.c.bf16 %v2015_v44, %v2014_v43  ;;  %v2016_v49 = vld [vmem:[%s4161_s1 + $0xf0] sm:$0xff]  ;;  %s352_s21 = scalar_lea.vmem %s4169_s9, %s2184_s16 }
  0x10   : > { %s3469_s15 = scalar_lea.vmem %s4160_s0, %s3358_s23  ;;  %2943 = vmatprep.subr.bf16.mxu1 %v2942_v23  ;;  %v2017_v50 = vld [vmem:[%s4161_s1 + $0xf8] sm:$0xff]  ;;  %v3062_v51 = vpack.c.bf16 %v2067_v47, %v2066_v46  ;;  %v2068_v52 = vld [vmem:[%s4161_s1 + $0x210] sm:$0xff]  ;;  %v361_v56 = vld [vmem:[%s4161_s1] sm:$0xff]  ;;  %s4047_s23 = scalar_lea.vmem %s4165_s5, %s2184_s16 }
  0x11   : > { %v2034_v15 = vld [vmem:[%s3469_s15 + $0x120] sm:$0xff]  ;;  %3041 = vmatpush3.bf16.msra.mxu0 %v3038_v8  ;;  %v1994_v35 = vld [vmem:[%s3469_s15 + $0x90] sm:$0xff]  ;;  %v2069_v53 = vld [vmem:[%s4161_s1 + $0x218] sm:$0xff]  ;;  %v2962_v54 = vpack.c.bf16 %v2017_v50, %v2016_v49 }
  0x12   : > { %2614 = vmatprep.mubr.f32.mxu0 %v2034_v15  ;;  %3043 = vmatprep.subr.bf16.mxu0 %v3042_v19  ;;  %v2035_v55 = vld [vmem:[%s3469_s15 + $0x130] sm:$0xff]  ;;  %v362_v57 = vld [vmem:[%s4161_s1 + $0x8] sm:$0xff]  ;;  %v3066_v58 = vpack.c.bf16 %v2069_v53, %v2068_v52  ;;  %v2036_v59 = vld [vmem:[%s3469_s15 + $0x140] sm:$0xff] }
  0x13   : > { %2945 = vmatpush3.bf16.msra.mxu1 %v2942_v23  ;;  %2482 = vmatprep.mubr.f32.mxu1 %v1994_v35  ;;  %v2070_v60 = vld [vmem:[%s4161_s1 + $0x220] sm:$0xff]  ;;  %v2071_v61 = vld [vmem:[%s4161_s1 + $0x228] sm:$0xff]  ;;  %v2966_v62 = vpack.c.bf16 %v362_v57, %v361_v56  ;;  %v2037_v63 = vld [vmem:[%s3469_s15 + $0x150] sm:$0xff] }
  0x14   : > { %2947 = vmatprep.subr.bf16.mxu1 %v2946_v29  ;;  %v363_v0 = vld [vmem:[%s4161_s1 + $0x10] sm:$0xff]  ;;  %v364_v1 = vld [vmem:[%s4161_s1 + $0x18] sm:$0xff]  ;;  %v3070_v2 = vpack.c.bf16 %v2071_v61, %v2070_v60  ;;  %v2038_v3 = vld [vmem:[%s3469_s15 + $0x160] sm:$0xff] }
  0x15   : > { %3045 = vmatpush3.bf16.msra.mxu0 %v3042_v19  ;;  %v2072_v4 = vld [vmem:[%s4161_s1 + $0x230] sm:$0xff]  ;;  %v2073_v5 = vld [vmem:[%s4161_s1 + $0x238] sm:$0xff]  ;;  %v3580_v6 = vld [vmem:[%s3469_s15 + $0xa0] sm:$0xff]  ;;  %v2970_v7 = vpack.c.bf16 %v364_v1, %v363_v0 }
  0x16   : > { %3047 = vmatprep.subr.bf16.mxu0 %v3046_v26  ;;  %v3583_v8 = vld [vmem:[%s3469_s15 + $0xb0] sm:$0xff]  ;;  %v365_v10 = vld [vmem:[%s4161_s1 + $0x20] sm:$0xff]  ;;  %v366_v11 = vld [vmem:[%s4161_s1 + $0x28] sm:$0xff]  ;;  %v3074_v12 = vpack.c.bf16 %v2073_v5, %v2072_v4 }
  0x17   : > { %2949 = vmatpush3.bf16.msra.mxu1 %v2946_v29  ;;  %v2039_v9 = vld [vmem:[%s3469_s15 + $0x170] sm:$0xff]  ;;  %v2040_v13 = vld [vmem:[%s3469_s15 + $0x180] sm:$0xff]  ;;  %v2075_v15 = vld [vmem:[%s4161_s1 + $0x248] sm:$0xff]  ;;  %v2974_v17 = vpack.c.bf16 %v366_v11, %v365_v10 }
  0x18   : > { %2951 = vmatprep.subr.bf16.mxu1 %v2950_v36  ;;  %v2074_v14 = vld [vmem:[%s4161_s1 + $0x240] sm:$0xff]  ;;  %v3605_v18 = vld [vmem:[%s3469_s15 + $0xd0] sm:$0xff]  ;;  %v368_v21 = vld [vmem:[%s4161_s1 + $0x38] sm:$0xff] }
  0x19   : > { %3049 = vmatpush3.bf16.msra.mxu0 %v3046_v26  ;;  %v3602_v16 = vld [vmem:[%s3469_s15 + $0xc0] sm:$0xff]  ;;  %v2041_v19 = vld [vmem:[%s3469_s15 + $0x190] sm:$0xff]  ;;  %v3078_v22 = vpack.c.bf16 %v2075_v15, %v2074_v14  ;;  %v2077_v25 = vld [vmem:[%s4161_s1 + $0x258] sm:$0xff] }
  0x1a   : > { %3051 = vmatprep.subr.bf16.mxu0 %v3050_v32  ;;  %v367_v20 = vld [vmem:[%s4161_s1 + $0x30] sm:$0xff]  ;;  %v3624_v26 = vld [vmem:[%s3469_s15 + $0xe0] sm:$0xff]  ;;  %v370_v30 = vld [vmem:[%s4161_s1 + $0x48] sm:$0xff] }
  0x1b   : > { %2953 = vmatpush3.bf16.msra.mxu1 %v2950_v36  ;;  %v2058_v23 = vld [vmem:[%s3469_s15 + $0x1b0] sm:$0xff]  ;;  %v2978_v27 = vpack.c.bf16 %v368_v21, %v367_v20  ;;  %v369_v29 = vld [vmem:[%s4161_s1 + $0x40] sm:$0xff]  ;;  %v2079_v33 = vld [vmem:[%s4161_s1 + $0x268] sm:$0xff] }
  0x1c   : > { %2955 = vmatprep.subr.bf16.mxu1 %v2954_v42  ;;  %v2076_v24 = vld [vmem:[%s4161_s1 + $0x250] sm:$0xff]  ;;  %v3644_v34 = vld [vmem:[%s3469_s15 + $0x100] sm:$0xff]  ;;  %v2982_v35 = vpack.c.bf16 %v370_v30, %v369_v29  ;;  %v372_v38 = vld [vmem:[%s4161_s1 + $0x58] sm:$0xff] }
  0x1d   : > { %3053 = vmatpush3.bf16.msra.mxu0 %v3050_v32  ;;  %v3627_v28 = vld [vmem:[%s3469_s15 + $0xf0] sm:$0xff]  ;;  %v3082_v31 = vpack.c.bf16 %v2077_v25, %v2076_v24  ;;  %v2078_v32 = vld [vmem:[%s4161_s1 + $0x260] sm:$0xff]  ;;  %v2081_v41 = vld [vmem:[%s4161_s1 + $0x278] sm:$0xff] }
  0x1e   : > { %3055 = vmatprep.subr.bf16.mxu0 %v3054_v39  ;;  %v353_v36 = vld [vmem:[%s3469_s15] sm:$0xff]  ;;  %v371_v37 = vld [vmem:[%s4161_s1 + $0x50] sm:$0xff]  ;;  %v374_v44 = vld [vmem:[%s4161_s1 + $0x68] sm:$0xff] }
  0x1f   : > { %2957 = vmatpush3.bf16.msra.mxu1 %v2954_v42  ;;  %v2080_v40 = vld [vmem:[%s4161_s1 + $0x270] sm:$0xff]  ;;  %v2986_v42 = vpack.c.bf16 %v372_v38, %v371_v37  ;;  %v373_v43 = vld [vmem:[%s4161_s1 + $0x60] sm:$0xff]  ;;  %v2091_v47 = vld [vmem:[%s4161_s1 + $0x288] sm:$0xff] }
  0x20   : > { %2959 = vmatprep.subr.bf16.mxu1 %v2958_v48  ;;  %v2090_v46 = vld [vmem:[%s4161_s1 + $0x280] sm:$0xff]  ;;  %v375_v49 = vld [vmem:[%s4161_s1 + $0x70] sm:$0xff]  ;;  %v376_v50 = vld [vmem:[%s4161_s1 + $0x78] sm:$0xff] }
  0x21   : > { %3057 = vmatpush3.bf16.msra.mxu0 %v3054_v39  ;;  %v3086_v39 = vpack.c.bf16 %v2079_v33, %v2078_v32  ;;  %v2092_v52 = vld [vmem:[%s4161_s1 + $0x290] sm:$0xff]  ;;  %v2093_v53 = vld [vmem:[%s4161_s1 + $0x298] sm:$0xff]  ;;  %v2018_v56 = vld [vmem:[%s4161_s1 + $0x100] sm:$0xff] }
  0x22   : > { %3059 = vmatprep.subr.bf16.mxu0 %v3058_v45  ;;  %v2019_v57 = vld [vmem:[%s4161_s1 + $0x108] sm:$0xff]  ;;  %v2094_v60 = vld [vmem:[%s4161_s1 + $0x2a0] sm:$0xff]  ;;  %v2020_v0 = vld [vmem:[%s4161_s1 + $0x110] sm:$0xff] }
  0x23   : > { %2961 = vmatpush3.bf16.msra.mxu1 %v2958_v48  ;;  %v2990_v48 = vpack.c.bf16 %v374_v44, %v373_v43  ;;  %v2095_v61 = vld [vmem:[%s4161_s1 + $0x2a8] sm:$0xff]  ;;  %v2021_v1 = vld [vmem:[%s4161_s1 + $0x118] sm:$0xff]  ;;  %v2096_v4 = vld [vmem:[%s4161_s1 + $0x2b0] sm:$0xff] }
  0x24   : > { %2963 = vmatprep.subr.bf16.mxu1 %v2962_v54  ;;  %v2097_v5 = vld [vmem:[%s4161_s1 + $0x2b8] sm:$0xff]  ;;  %v3716_v10 = vld [vmem:[%s3469_s15 + $0x20] sm:$0xff]  ;;  %v2064_v15 = vld [vmem:[%s3469_s15 + $0x210] sm:$0xff] }
  0x25   : > { %3061 = vmatpush3.bf16.msra.mxu0 %v3058_v45  ;;  %v3090_v45 = vpack.c.bf16 %v2081_v41, %v2080_v40  ;;  %v2063_v11 = vld [vmem:[%s3469_s15 + $0x200] sm:$0xff]  ;;  %v3106_v14 = vpack.c.bf16 %v2097_v5, %v2096_v4  ;;  %v3735_v20 = vld [vmem:[%s3469_s15 + $0x30] sm:$0xff]  ;;  %v2025_v25 = vld [vmem:[%s4161_s1 + $0x138] sm:$0xff] }
  0x26   : > { %3063 = vmatprep.subr.bf16.mxu0 %v3062_v51  ;;  %v2024_v24 = vld [vmem:[%s4161_s1 + $0x130] sm:$0xff]  ;;  %v2082_v29 = vld [vmem:[%s3469_s15 + $0x121] sm:$0xff] }
  0x27   : > { %2965 = vmatpush3.bf16.msra.mxu1 %v2962_v54  ;;  %v2994_v54 = vpack.c.bf16 %v376_v50, %v375_v49  ;;  %v2100_v30 = vld [vmem:[%s4161_s1 + $0x2d0] sm:$0xff]  ;;  %v3010_v33 = vpack.c.bf16 %v2025_v25, %v2024_v24  ;;  %v2027_v37 = vld [vmem:[%s4161_s1 + $0x148] sm:$0xff]  ;;  %v2030_v50 = vld [vmem:[%s4161_s1 + $0x160] sm:$0xff] }
  0x28   : > { %2615 = vmatmul.mubr.f32.vlgmr.msra.gmra.mrb[0].mxu0 %v2035_v55  ;;  %2967 = vmatprep.subr.bf16.mxu1 %v2966_v62  ;;  %v2059_v55 = vld [vmem:[%s3469_s15 + $0x1c0] sm:$0xff]  ;;  %v3757_v32 = vld [vmem:[%s3469_s15 + $0x50] sm:$0xff]  ;;  %v2103_v40 = vld [vmem:[%s4161_s1 + $0x2e8] sm:$0xff] }
  0x29   : > { %3065 = vmatpush3.bf16.msra.mxu0 %v3062_v51  ;;  %2617 = vmatprep.mubr.f32.mxu0 %v2036_v59  ;;  %v3094_v51 = vpack.c.bf16 %v2091_v47, %v2090_v46  ;;  %v2060_v59 = vld [vmem:[%s3469_s15 + $0x1d0] sm:$0xff]  ;;  %v613_v43 = vld [vmem:[%s3469_s15 + $0x1] sm:$0xff] }
  0x2a   : > { %3067 = vmatprep.subr.bf16.mxu0 %v3066_v58  ;;  %2483 = vmatmul.mubr.f32.vlgmr.msra.gmra.mrb[0].mxu1 %v3580_v6  ;;  %v3777_v41 = vld [vmem:[%s3469_s15 + $0x70] sm:$0xff]  ;;  %v2086_v5 = vld [vmem:[%s3469_s15 + $0x161] sm:$0xff] }
  0x2b   : > { %2969 = vmatpush3.bf16.msra.mxu1 %v2966_v62  ;;  %2485 = vmatprep.mubr.f32.mxu1 %v3583_v8  ;;  %v2998_v62 = vpack.c.bf16 %v2019_v57, %v2018_v56  ;;  %v2028_v44 = vld [vmem:[%s4161_s1 + $0x150] sm:$0xff]  ;;  %v2033_v57 = vld [vmem:[%s4161_s1 + $0x178] sm:$0xff]  ;;  %v3853_v24 = vld [vmem:[%s3469_s15 + $0x41] sm:$0xff] }
  0x2c   : > { %2618 = vmatmul.mubr.f32.gmra.mrb[2].mxu0 %v2037_v63  ;;  %2971 = vmatprep.subr.bf16.mxu1 %v2970_v7  ;;  %v2061_v63 = vld [vmem:[%s3469_s15 + $0x1e0] sm:$0xff]  ;;  %v2104_v47 = vld [vmem:[%s4161_s1 + $0x2f0] sm:$0xff] }
  0x2d   : > { %3069 = vmatpush3.bf16.msra.mxu0 %v3066_v58  ;;  %2620 = vmatprep.mubr.f32.mxu0 %v2038_v3  ;;  %v3098_v58 = vpack.c.bf16 %v2093_v53, %v2092_v52  ;;  %v2062_v3 = vld [vmem:[%s3469_s15 + $0x1f0] sm:$0xff]  ;;  %v2114_v53 = vld [vmem:[%s4161_s1 + $0x300] sm:$0xff] }
  0x2e   : > { %3071 = vmatprep.subr.bf16.mxu0 %v3070_v2  ;;  %2486 = vmatmul.mubr.f32.gmra.mrb[2].mxu1 %v3602_v16  ;;  %v2032_v56 = vld [vmem:[%s4161_s1 + $0x170] sm:$0xff] }
  0x2f   : > { %2973 = vmatpush3.bf16.msra.mxu1 %v2970_v7  ;;  %2488 = vmatprep.mubr.f32.mxu1 %v3605_v18  ;;  %v3713_v7 = vld [vmem:[%s3469_s15 + $0x10] sm:$0xff] }
  0x30   : > { %2621 = vmatmul.mubr.f32.gmra.mrb[4].mxu0 %v2039_v9  ;;  %2975 = vmatprep.subr.bf16.mxu1 %v2974_v17  ;;  %v3002_v9 = vpack.c.bf16 %v2021_v1, %v2020_v0  ;;  %v2084_v0 = vld [vmem:[%s3469_s15 + $0x141] sm:$0xff]  ;;  %v2089_v25 = vld [vmem:[%s3469_s15 + $0x191] sm:$0xff] }
  0x31   : > { %3073 = vmatpush3.bf16.msra.mxu0 %v3070_v2  ;;  %2623 = vmatprep.mubr.f32.mxu0 %v2040_v13  ;;  %v3102_v2 = vpack.c.bf16 %v2095_v61, %v2094_v60  ;;  %v2023_v13 = vld [vmem:[%s4161_s1 + $0x128] sm:$0xff]  ;;  %v2117_v60 = vld [vmem:[%s4161_s1 + $0x318] sm:$0xff]  ;;  %v3026_v61 = vpack.c.bf16 %v2033_v57, %v2032_v56  ;;  %v2118_v1 = vld [vmem:[%s4161_s1 + $0x320] sm:$0xff] }
  0x32   : > { %3075 = vmatprep.subr.bf16.mxu0 %v3074_v12  ;;  %2489 = vmatmul.mubr.f32.gmra.mrb[4].mxu1 %v3624_v26  ;;  %v2113_v56 = vld [vmem:[%s3469_s15 + $0x80] sm:$0xff]  ;;  %v2149_v57 = vld [vmem:[%s4161_s1 + $0x3d8] sm:$0xff] }
  0x33   : > { %2977 = vmatpush3.bf16.msra.mxu1 %v2974_v17  ;;  %2491 = vmatprep.mubr.f32.mxu1 %v3627_v28  ;;  %v2098_v17 = vld [vmem:[%s4161_s1 + $0x2c0] sm:$0xff] }
  0x34   : > { %2624 = vmatmul.mubr.f32.gmra.mrb[6].mxu0 %v2041_v19  ;;  %2979 = vmatprep.subr.bf16.mxu1 %v2978_v27  ;;  %v2099_v19 = vld [vmem:[%s4161_s1 + $0x2c8] sm:$0xff] }
  0x35   : > { %3077 = vmatpush3.bf16.msra.mxu0 %v3074_v12  ;;  %2658 = vmatprep.mubr.f32.mxu0 %v2058_v23  ;;  %v2022_v12 = vld [vmem:[%s4161_s1 + $0x120] sm:$0xff] }
  0x36   : > { %3079 = vmatprep.subr.bf16.mxu0 %v3078_v22  ;;  %2492 = vmatmul.mubr.f32.gmra.mrb[6].mxu1 %v3644_v34  ;;  %v3006_v21 = vpack.c.bf16 %v2023_v13, %v2022_v12  ;;  %v2065_v23 = vld [vmem:[%s3469_s15 + $0x220] sm:$0xff]  ;;  %v3834_v12 = vld [vmem:[%s3469_s15 + $0x11] sm:$0xff] }
  0x37   : > { %2981 = vmatpush3.bf16.msra.mxu1 %v2978_v27  ;;  %2526 = vmatprep.mubr.f32.mxu1 %v353_v36  ;;  %v3110_v27 = vpack.c.bf16 %v2099_v19, %v2098_v17  ;;  %v2026_v36 = vld [vmem:[%s4161_s1 + $0x140] sm:$0xff] }
  0x38   : > { %2983 = vmatprep.subr.bf16.mxu1 %v2982_v35  ;;  %v3837_v13 = vld [vmem:[%s3469_s15 + $0x21] sm:$0xff] }
  0x39   : > { %3081 = vmatpush3.bf16.msra.mxu0 %v3078_v22  ;;  %v3738_v22 = vld [vmem:[%s3469_s15 + $0x40] sm:$0xff] }
  0x3a   : > { %3083 = vmatprep.subr.bf16.mxu0 %v3082_v31  ;;  %v2088_v17 = vld [vmem:[%s3469_s15 + $0x181] sm:$0xff] }
  0x3b   : > { %2985 = vmatpush3.bf16.msra.mxu1 %v2982_v35  ;;  %v3760_v35 = vld [vmem:[%s3469_s15 + $0x60] sm:$0xff] }
  0x3c   : > { %2987 = vmatprep.subr.bf16.mxu1 %v2986_v42  ;;  %v2122_v19 = vld [vmem:[%s4161_s1 + $0x340] sm:$0xff] }
  0x3d   : > { %3085 = vmatpush3.bf16.msra.mxu0 %v3082_v31  ;;  %v2101_v31 = vld [vmem:[%s4161_s1 + $0x2d8] sm:$0xff] }
  0x3e   : > { %3087 = vmatprep.subr.bf16.mxu0 %v3086_v39  ;;  %v3114_v38 = vpack.c.bf16 %v2101_v31, %v2100_v30  ;;  %v2125_v30 = vld [vmem:[%s4161_s1 + $0x358] sm:$0xff] }
  0x3f   : > { %2989 = vmatpush3.bf16.msra.mxu1 %v2986_v42  ;;  %v3014_v42 = vpack.c.bf16 %v2027_v37, %v2026_v36  ;;  %v3865_v31 = vld [vmem:[%s3469_s15 + $0x51] sm:$0xff]  ;;  %v2126_v37 = vld [vmem:[%s4161_s1 + $0x360] sm:$0xff] }
  0x40   : > { %2991 = vmatprep.subr.bf16.mxu1 %v2990_v48 }
  0x41   : > { %3089 = vmatpush3.bf16.msra.mxu0 %v3086_v39  ;;  %v2102_v39 = vld [vmem:[%s4161_s1 + $0x2e0] sm:$0xff] }
  0x42   : > { %3091 = vmatprep.subr.bf16.mxu0 %v3090_v45  ;;  %v3118_v46 = vpack.c.bf16 %v2103_v40, %v2102_v39  ;;  %v3880_v39 = vld [vmem:[%s3469_s15 + $0x71] sm:$0xff] }
  0x43   : > { %2993 = vmatpush3.bf16.msra.mxu1 %v2990_v48  ;;  %v2105_v48 = vld [vmem:[%s4161_s1 + $0x2f8] sm:$0xff] }
  0x44   : > { %2995 = vmatprep.subr.bf16.mxu1 %v2994_v54  ;;  %v3122_v52 = vpack.c.bf16 %v2105_v48, %v2104_v47  ;;  %v2140_v47 = vld [vmem:[%s4161_s1 + $0x390] sm:$0xff]  ;;  %v2141_v48 = vld [vmem:[%s4161_s1 + $0x398] sm:$0xff] }
  0x45   : > { %3093 = vmatpush3.bf16.msra.mxu0 %v3090_v45  ;;  %v2029_v45 = vld [vmem:[%s4161_s1 + $0x158] sm:$0xff] }
  0x46   : > { %3095 = vmatprep.subr.bf16.mxu0 %v3094_v51  ;;  %v3018_v49 = vpack.c.bf16 %v2029_v45, %v2028_v44  ;;  %v2138_v44 = vld [vmem:[%s4161_s1 + $0x380] sm:$0xff]  ;;  %v2139_v45 = vld [vmem:[%s4161_s1 + $0x388] sm:$0xff] }
  0x47   : > { %2997 = vmatpush3.bf16.msra.mxu1 %v2994_v54  ;;  %v2115_v54 = vld [vmem:[%s4161_s1 + $0x308] sm:$0xff] }
  0x48   : > { %2659 = vmatmul.mubr.f32.vlgmr.msra.gmra.mrb[0].mxu0 %v2059_v55  ;;  %2999 = vmatprep.subr.bf16.mxu1 %v2998_v62 }
  0x49   : > { %3097 = vmatpush3.bf16.msra.mxu0 %v3094_v51  ;;  %2661 = vmatprep.mubr.f32.mxu0 %v2060_v59  ;;  %v2031_v51 = vld [vmem:[%s4161_s1 + $0x168] sm:$0xff]  ;;  %v2116_v59 = vld [vmem:[%s4161_s1 + $0x310] sm:$0xff] }
  0x4a   : > { %3099 = vmatprep.subr.bf16.mxu0 %v3098_v58  ;;  %2527 = vmatmul.mubr.f32.vlgmr.msra.gmra.mrb[0].mxu1 %v3713_v7  ;;  %v3022_v55 = vpack.c.bf16 %v2031_v51, %v2030_v50  ;;  %v2142_v50 = vld [vmem:[%s4161_s1 + $0x3a0] sm:$0xff]  ;;  %v2143_v51 = vld [vmem:[%s4161_s1 + $0x3a8] sm:$0xff] }
  0x4b   : > { %3001 = vmatpush3.bf16.msra.mxu1 %v2998_v62  ;;  %2529 = vmatprep.mubr.f32.mxu1 %v3716_v10  ;;  %v2083_v62 = vld [vmem:[%s3469_s15 + $0x131] sm:$0xff] }
  0x4c   : > { %2662 = vmatmul.mubr.f32.gmra.mrb[2].mxu0 %v2061_v63  ;;  %3003 = vmatprep.subr.bf16.mxu1 %v3002_v9  ;;  %v3130_v63 = vpack.c.bf16 %v2117_v60, %v2116_v59  ;;  %v2152_v60 = vld [vmem:[%s4161_s1 + $0x3f0] sm:$0xff] }
  0x4d   : > { %3101 = vmatpush3.bf16.msra.mxu0 %v3098_v58  ;;  %2664 = vmatprep.mubr.f32.mxu0 %v2062_v3  ;;  %v3126_v58 = vpack.c.bf16 %v2115_v54, %v2114_v53  ;;  %v2085_v3 = vld [vmem:[%s3469_s15 + $0x151] sm:$0xff] }
  0x4e   : > { %3103 = vmatprep.subr.bf16.mxu0 %v3102_v2  ;;  %2530 = vmatmul.mubr.f32.gmra.mrb[2].mxu1 %v3735_v20  ;;  %v2144_v53 = vld [vmem:[%s4161_s1 + $0x3b0] sm:$0xff]  ;;  %v2145_v54 = vld [vmem:[%s4161_s1 + $0x3b8] sm:$0xff] }
  0x4f   : > { %3005 = vmatpush3.bf16.msra.mxu1 %v3002_v9  ;;  %2532 = vmatprep.mubr.f32.mxu1 %v3738_v22  ;;  %v2120_v9 = vld [vmem:[%s4161_s1 + $0x330] sm:$0xff] }
  0x50   : > { %2665 = vmatmul.mubr.f32.gmra.mrb[4].mxu0 %v2063_v11  ;;  %3007 = vmatprep.subr.bf16.mxu1 %v3006_v21  ;;  %v2121_v11 = vld [vmem:[%s4161_s1 + $0x338] sm:$0xff] }
  0x51   : > { %3105 = vmatpush3.bf16.msra.mxu0 %v3102_v2  ;;  %2667 = vmatprep.mubr.f32.mxu0 %v2064_v15  ;;  %v2119_v2 = vld [vmem:[%s4161_s1 + $0x328] sm:$0xff]  ;;  %v3138_v15 = vpack.c.bf16 %v2121_v11, %v2120_v9  ;;  %v2168_v11 = vld [vmem:[%s4161_s1 + $0x430] sm:$0xff] }
  0x52   : > { %3107 = vmatprep.subr.bf16.mxu0 %v3106_v14  ;;  %2533 = vmatmul.mubr.f32.gmra.mrb[4].mxu1 %v3757_v32  ;;  %v3134_v4 = vpack.c.bf16 %v2119_v2, %v2118_v1  ;;  %v2164_v1 = vld [vmem:[%s4161_s1 + $0x410] sm:$0xff]  ;;  %v2165_v2 = vld [vmem:[%s4161_s1 + $0x418] sm:$0xff] }
  0x53   : > { %3009 = vmatpush3.bf16.msra.mxu1 %v3006_v21  ;;  %2535 = vmatprep.mubr.f32.mxu1 %v3760_v35  ;;  %v2123_v21 = vld [vmem:[%s4161_s1 + $0x348] sm:$0xff] }
  0x54   : > { %2668 = vmatmul.mubr.f32.gmra.mrb[6].mxu0 %v2065_v23  ;;  %3011 = vmatprep.subr.bf16.mxu1 %v3010_v33  ;;  %v3850_v23 = vld [vmem:[%s3469_s15 + $0x31] sm:$0xff] }
  0x55   : > { %3109 = vmatpush3.bf16.msra.mxu0 %v3106_v14  ;;  %2702 = vmatprep.mubr.f32.mxu0 %v2082_v29  ;;  %v2087_v14 = vld [vmem:[%s3469_s15 + $0x171] sm:$0xff] }
  0x56   : > { %3111 = vmatprep.subr.bf16.mxu0 %v3110_v27  ;;  %2536 = vmatmul.mubr.f32.gmra.mrb[6].mxu1 %v3777_v41  ;;  %v2124_v29 = vld [vmem:[%s4161_s1 + $0x350] sm:$0xff] }
  0x57   : > { %3013 = vmatpush3.bf16.msra.mxu1 %v3010_v33  ;;  %2570 = vmatprep.mubr.f32.mxu1 %v613_v43  ;;  %v3868_v33 = vld [vmem:[%s3469_s15 + $0x61] sm:$0xff]  ;;  %v3146_v36 = vpack.c.bf16 %v2125_v30, %v2124_v29 }
  0x58   : > { %3015 = vmatprep.subr.bf16.mxu1 %v3014_v42  ;;  %v1683_v30 = vld [vmem:[%s4168_s8] sm:$0xff] }
  0x59   : > { %3113 = vmatpush3.bf16.msra.mxu0 %v3110_v27  ;;  %v3142_v27 = vpack.c.bf16 %v2123_v21, %v2122_v19  ;;  %v2173_v19 = vld [vmem:[%s4161_s1 + $0x458] sm:$0xff]  ;;  %v2175_v21 = vld [vmem:[%s4161_s1 + $0x468] sm:$0xff] }
  0x5a   : > { %3115 = vmatprep.subr.bf16.mxu0 %v3114_v38 }
  0x5b   : > { %3017 = vmatpush3.bf16.msra.mxu1 %v3014_v42  ;;  %v2129_v42 = vld [vmem:[%s4161_s1 + $0x378] sm:$0xff] }
  0x5c   : > { %3019 = vmatprep.subr.bf16.mxu1 %v3018_v49 }
  0x5d   : > { %3117 = vmatpush3.bf16.msra.mxu0 %v3114_v38  ;;  %v2127_v38 = vld [vmem:[%s4161_s1 + $0x368] sm:$0xff] }
  0x5e   : > { %3119 = vmatprep.subr.bf16.mxu0 %v3118_v46  ;;  %v3150_v40 = vpack.c.bf16 %v2127_v38, %v2126_v37  ;;  %v1685_v37 = vld [vmem:[%s4168_s8 + $0x10] sm:$0xff] }
  0x5f   : > { %3021 = vmatpush3.bf16.msra.mxu1 %v3018_v49  ;;  %v3162_v49 = vpack.c.bf16 %v2141_v48, %v2140_v47  ;;  %v1692_v48 = vld [vmem:[%s4168_s8 + $0x48] sm:$0xff] }
  0x60   : > { %3023 = vmatprep.subr.bf16.mxu1 %v3022_v55 }
  0x61   : > { %3121 = vmatpush3.bf16.msra.mxu0 %v3118_v46  ;;  %v3158_v46 = vpack.c.bf16 %v2139_v45, %v2138_v44  ;;  %v1689_v45 = vld [vmem:[%s4168_s8 + $0x30] sm:$0xff] }
  0x62   : > { %3123 = vmatprep.subr.bf16.mxu0 %v3122_v52 }
  0x63   : > { %3025 = vmatpush3.bf16.msra.mxu1 %v3022_v55  ;;  %v2147_v55 = vld [vmem:[%s4161_s1 + $0x3c8] sm:$0xff] }
  0x64   : > { %3027 = vmatprep.subr.bf16.mxu1 %v3026_v61 }
  0x65   : > { %3125 = vmatpush3.bf16.msra.mxu0 %v3122_v52  ;;  %v3166_v52 = vpack.c.bf16 %v2143_v51, %v2142_v50  ;;  %v4054_v50 = vld [vmem:[%s4166_s6] ss:$0 sm:$0xff] }
  0x66   : > { %3127 = vmatprep.subr.bf16.mxu0 %v3126_v58  ;;  %v4059_v51 = vld [vmem:[%s4167_s7] ss:$0 sm:$0xff] }
  0x67   : > { %3029 = vmatpush3.bf16.msra.mxu1 %v3026_v61 }
  0x68   : > { %2703 = vmatmul.mubr.f32.vlgmr.msra.gmra.mrb[0].mxu0 %v2083_v62  ;;  %v2162_v62 = vld [vmem:[%s4161_s1 + $0x400] sm:$0xff] }
  0x69   : > { %3129 = vmatpush3.bf16.msra.mxu0 %v3126_v58  ;;  %2705 = vmatprep.mubr.f32.mxu0 %v2084_v0  ;;  %v2151_v58 = vld [vmem:[%s4161_s1 + $0x3e8] sm:$0xff] }
  0x6a   : > { %3131 = vmatprep.subr.bf16.mxu0 %v3130_v63  ;;  %2571 = vmatmul.mubr.f32.vlgmr.msra.gmra.mrb[0].mxu1 %v3834_v12 }
  0x6b   : > { %2573 = vmatprep.mubr.f32.mxu1 %v3837_v13 }
  0x6c   : > { %2706 = vmatmul.mubr.f32.gmra.mrb[2].mxu0 %v2085_v3  ;;  %v3194_v3 = vpack.c.bf16 %v2165_v2, %v2164_v1  ;;  %v1623_v1 = vld [vmem:[%s4164_s4 + $0x10] sm:$0xff]  ;;  %v1624_v2 = vld [vmem:[%s4164_s4 + $0x18] sm:$0xff] }
  0x6d   : > { %3133 = vmatpush3.bf16.msra.mxu0 %v3130_v63  ;;  %2708 = vmatprep.mubr.f32.mxu0 %v2086_v5  ;;  %v2163_v63 = vld [vmem:[%s4161_s1 + $0x408] sm:$0xff] }
  0x6e   : > { %3135 = vmatprep.subr.bf16.mxu0 %v3134_v4  ;;  %2574 = vmatmul.mubr.f32.gmra.mrb[2].mxu1 %v3850_v23  ;;  %v3190_v0 = vpack.c.bf16 %v2163_v63, %v2162_v62  ;;  %v2167_v5 = vld [vmem:[%s4161_s1 + $0x428] sm:$0xff] }
  0x6f   : > { %2576 = vmatprep.mubr.f32.mxu1 %v3853_v24 }
  0x70   : > { %2709 = vmatmul.mubr.f32.gmra.mrb[4].mxu0 %v2087_v14  ;;  %v2169_v14 = vld [vmem:[%s4161_s1 + $0x438] sm:$0xff] }
  0x71   : > { %3137 = vmatpush3.bf16.msra.mxu0 %v3134_v4  ;;  %2711 = vmatprep.mubr.f32.mxu0 %v2088_v17  ;;  %v2166_v4 = vld [vmem:[%s4161_s1 + $0x420] sm:$0xff]  ;;  %v2137_v17 = vld [vmem:[%s3469_s15 + $0x110] sm:$0xff] }
  0x72   : > { %3139 = vmatprep.subr.bf16.mxu0 %v3138_v15  ;;  %2577 = vmatmul.mubr.f32.gmra.mrb[4].mxu1 %v3865_v31  ;;  %v3198_v9 = vpack.c.bf16 %v2167_v5, %v2166_v4 }
  0x73   : > { %2579 = vmatprep.mubr.f32.mxu1 %v3868_v33 }
  0x74   : > { %2712 = vmatmul.mubr.f32.gmra.mrb[6].mxu0 %v2089_v25 }
  0x75   : > { %3141 = vmatpush3.bf16.msra.mxu0 %v3138_v15  ;;  %2746 = vmatprep.mubr.f32.mxu0 %v3713_v7  ;;  %v2128_v7 = vld [vmem:[%s4161_s1 + $0x370] sm:$0xff]  ;;  %v2171_v15 = vld [vmem:[%s4161_s1 + $0x448] sm:$0xff] }
  0x76   : > { %3143 = vmatprep.subr.bf16.mxu0 %v3142_v27  ;;  %2580 = vmatmul.mubr.f32.gmra.mrb[6].mxu1 %v3880_v39  ;;  %v3154_v43 = vpack.c.bf16 %v2129_v42, %v2128_v7  ;;  %v1687_v42 = vld [vmem:[%s4168_s8 + $0x20] sm:$0xff] }
  0x79   : > { %3145 = vmatpush3.bf16.msra.mxu0 %v3142_v27  ;;  %v2176_v27 = vld [vmem:[%s4161_s1 + $0x470] sm:$0xff] }
  0x7a   : > { %3147 = vmatprep.subr.bf16.mxu0 %v3146_v36 }
  0x7d   : > { %3149 = vmatpush3.bf16.msra.mxu0 %v3146_v36  ;;  %v1684_v36 = vld [vmem:[%s4168_s8 + $0x8] sm:$0xff] }
  0x7e   : > { %3151 = vmatprep.subr.bf16.mxu0 %v3150_v40  ;;  %v3222_v38 = vpack.c.bf16 %v1684_v36, %v1683_v30 }
  0x80   : > { %3223 = vmatprep.subr.bf16.mxu1 %v3222_v38 }
  0x81   : > { %3153 = vmatpush3.bf16.msra.mxu0 %v3150_v40  ;;  %v1686_v40 = vld [vmem:[%s4168_s8 + $0x18] sm:$0xff]  ;;  %3225 = vmatpush3.bf16.msra.mxu1 %v3222_v38  ;;  %v1643_v38 = vld [vmem:[%s4047_s23 + $0x30] sm:$0xff] }
  0x82   : > { %3155 = vmatprep.subr.bf16.mxu0 %v3154_v43  ;;  %v3226_v7 = vpack.c.bf16 %v1686_v40, %v1685_v37 }
  0x84   : > { %3227 = vmatprep.subr.bf16.mxu1 %v3226_v7 }
  0x85   : > { %3157 = vmatpush3.bf16.msra.mxu0 %v3154_v43  ;;  %v1688_v43 = vld [vmem:[%s4168_s8 + $0x28] sm:$0xff]  ;;  %3229 = vmatpush3.bf16.msra.mxu1 %v3226_v7  ;;  %v1633_v7 = vld [vmem:[%s4164_s4 + $0x60] sm:$0xff] }
  0x86   : > { %3159 = vmatprep.subr.bf16.mxu0 %v3158_v46  ;;  %v3230_v44 = vpack.c.bf16 %v1688_v43, %v1687_v42  ;;  %v1634_v42 = vld [vmem:[%s4164_s4 + $0x68] sm:$0xff]  ;;  %v1658_v43 = vmul.f32 %v4054_v50, %v1643_v38 }
  0x88   : > { %2747 = vmatmul.mubr.f32.vlgmr.msra.gmra.mrb[0].mxu0 %v3716_v10  ;;  %v3170_v10 = vpack.c.bf16 %v2145_v54, %v2144_v53  ;;  %3231 = vmatprep.subr.bf16.mxu1 %v3230_v44 }
  0x89   : > { %3161 = vmatpush3.bf16.msra.mxu0 %v3158_v46  ;;  %2749 = vmatprep.mubr.f32.mxu0 %v3735_v20  ;;  %v2146_v20 = vld [vmem:[%s4161_s1 + $0x3c0] sm:$0xff]  ;;  %v1690_v46 = vld [vmem:[%s4168_s8 + $0x38] sm:$0xff] }
  0x8a   : > { %3163 = vmatprep.subr.bf16.mxu0 %v3162_v49  ;;  %v3234_v47 = vpack.c.bf16 %v1690_v46, %v1689_v45  ;;  %3233 = vmatpush3.bf16.msra.mxu1 %v3230_v44  ;;  %v1644_v44 = vld [vmem:[%s4047_s23 + $0x38] sm:$0xff]  ;;  %v3278_v46 = vpack.c.bf16 %v1634_v42, %v1633_v7 }
  0x8c   : > { %2750 = vmatmul.mubr.f32.gmra.mrb[2].mxu0 %v3738_v22  ;;  %v3174_v22 = vpack.c.bf16 %v2147_v55, %v2146_v20  ;;  %3235 = vmatprep.subr.bf16.mxu1 %v3234_v47  ;;  %v1696_v20 = vld [vmem:[%s4168_s8 + $0x68] sm:$0xff] }
  0x8d   : > { %3165 = vmatpush3.bf16.msra.mxu0 %v3162_v49  ;;  %2752 = vmatprep.mubr.f32.mxu0 %v3757_v32  ;;  %v2148_v32 = vld [vmem:[%s4161_s1 + $0x3d0] sm:$0xff]  ;;  %v1638_v55 = vld [vmem:[%s4047_s23 + $0x8] sm:$0xff] }
  0x8e   : > { %3167 = vmatprep.subr.bf16.mxu0 %v3166_v52  ;;  %v1693_v49 = vld [vmem:[%s4168_s8 + $0x50] sm:$0xff]  ;;  %3237 = vmatpush3.bf16.msra.mxu1 %v3234_v47  ;;  %v1659_v47 = vmul.f32 %v4054_v50, %v1644_v44 }
  0x90   : > { %2753 = vmatmul.mubr.f32.gmra.mrb[4].mxu0 %v3760_v35  ;;  %v3178_v35 = vpack.c.bf16 %v2149_v57, %v2148_v32  ;;  %v1697_v32 = vld [vmem:[%s4168_s8 + $0x70] sm:$0xff]  ;;  %v1698_v57 = vld [vmem:[%s4168_s8 + $0x78] sm:$0xff] }
  0x91   : > { %3169 = vmatpush3.bf16.msra.mxu0 %v3166_v52  ;;  %2755 = vmatprep.mubr.f32.mxu0 %v3777_v41  ;;  %v2150_v41 = vld [vmem:[%s4161_s1 + $0x3e0] sm:$0xff] }
  0x92   : > { %3171 = vmatprep.subr.bf16.mxu0 %v3170_v10  ;;  %v3182_v59 = vpack.c.bf16 %v2151_v58, %v2150_v41  ;;  %v2161_v52 = vld [vmem:[%s3469_s15 + $0x81] sm:$0xff]  ;;  %v1640_v58 = vld [vmem:[%s4047_s23 + $0x18] sm:$0xff] }
  0x93   : > { %v1655_v62 = vmul.f32 %v4054_v50, %v1640_v58 }
  0x94   : > { %2756 = vmatmul.mubr.f32.gmra.mrb[6].mxu0 %v2113_v56 }
  0x95   : > { %3173 = vmatpush3.bf16.msra.mxu0 %v3170_v10  ;;  %2790 = vmatprep.mubr.f32.mxu0 %v3580_v6  ;;  %v2153_v6 = vld [vmem:[%s4161_s1 + $0x3f8] sm:$0xff]  ;;  %v1695_v10 = vld [vmem:[%s4168_s8 + $0x60] sm:$0xff]  ;;  %v1670_v4 = vadd.f32 %v4059_v51, %v1655_v62 }
  0x96   : > { %3175 = vmatprep.subr.bf16.mxu0 %v3174_v22  ;;  %v3186_v61 = vpack.c.bf16 %v2153_v6, %v2152_v60  ;;  %v3246_v56 = vpack.c.bf16 %v1696_v20, %v1695_v10  ;;  %v1621_v60 = vld [vmem:[%s4164_s4] sm:$0xff]  ;;  %v1622_v6 = vld [vmem:[%s4164_s4 + $0x8] sm:$0xff] }
  0x99   : > { %3177 = vmatpush3.bf16.msra.mxu0 %v3174_v22  ;;  %v1639_v22 = vld [vmem:[%s4047_s23 + $0x10] sm:$0xff] }
  0x9a   : > { %3179 = vmatprep.subr.bf16.mxu0 %v3178_v35  ;;  %v1654_v41 = vmul.f32 %v4054_v50, %v1639_v22 }
  0x9c   : > { %v1669_v63 = vadd.f32 %v4059_v51, %v1654_v41 }
  0x9d   : > { %3181 = vmatpush3.bf16.msra.mxu0 %v3178_v35  ;;  %v1653_v35 = vmul.f32 %v4054_v50, %v1638_v55 }
  0x9e   : > { %3183 = vmatprep.subr.bf16.mxu0 %v3182_v59  ;;  %v1677_v5 = vmax.f32 %v1669_v63, 0.0 }
  0xa1   : > { %3185 = vmatpush3.bf16.msra.mxu0 %v3182_v59  ;;  %v3250_v59 = vpack.c.bf16 %v1698_v57, %v1697_v32  ;;  %v2179_v57 = vld [vmem:[%s4163_s3] ss:$0 sm:$0xff] }
  0xa2   : > { %3187 = vmatprep.subr.bf16.mxu0 %v3186_v61 }
  0xa5   : > { %3189 = vmatpush3.bf16.msra.mxu0 %v3186_v61  ;;  %v1668_v61 = vadd.f32 %v4059_v51, %v1653_v35 }
  0xa6   : > { %3191 = vmatprep.subr.bf16.mxu0 %v3190_v0 }
  0xa8   : > { %2791 = vmatmul.mubr.f32.vlgmr.msra.gmra.mrb[0].mxu0 %v3583_v8  ;;  %v3202_v8 = vpack.c.bf16 %v2169_v14, %v2168_v11  ;;  %v1625_v11 = vld [vmem:[%s4164_s4 + $0x20] sm:$0xff]  ;;  %v1626_v14 = vld [vmem:[%s4164_s4 + $0x28] sm:$0xff] }
  0xa9   : > { %3193 = vmatpush3.bf16.msra.mxu0 %v3190_v0  ;;  %2793 = vmatprep.mubr.f32.mxu0 %v3602_v16  ;;  %v2170_v16 = vld [vmem:[%s4161_s1 + $0x440] sm:$0xff]  ;;  %v3254_v0 = vpack.c.bf16 %v1622_v6, %v1621_v60 }
  0xaa   : > { %3195 = vmatprep.subr.bf16.mxu0 %v3194_v3 }
  0xac   : > { %2794 = vmatmul.mubr.f32.gmra.mrb[2].mxu0 %v3605_v18  ;;  %v3206_v18 = vpack.c.bf16 %v2171_v15, %v2170_v16  ;;  %v3262_v16 = vpack.c.bf16 %v1626_v14, %v1625_v11  ;;  %v1627_v15 = vld [vmem:[%s4164_s4 + $0x30] sm:$0xff] }
  0xad   : > { %3197 = vmatpush3.bf16.msra.mxu0 %v3194_v3  ;;  %2796 = vmatprep.mubr.f32.mxu0 %v3624_v26  ;;  %v2172_v26 = vld [vmem:[%s4161_s1 + $0x450] sm:$0xff]  ;;  %v1676_v3 = vmax.f32 %v1668_v61, 0.0 }
  0xae   : > { %3199 = vmatprep.subr.bf16.mxu0 %v3198_v9 }
  0xb0   : > { %2797 = vmatmul.mubr.f32.gmra.mrb[4].mxu0 %v3627_v28  ;;  %v3210_v28 = vpack.c.bf16 %v2173_v19, %v2172_v26  ;;  %v1629_v26 = vld [vmem:[%s4164_s4 + $0x40] sm:$0xff]  ;;  %v1630_v19 = vld [vmem:[%s4164_s4 + $0x48] sm:$0xff] }
  0xb1   : > { %3201 = vmatpush3.bf16.msra.mxu0 %v3198_v9  ;;  %2799 = vmatprep.mubr.f32.mxu0 %v3644_v34  ;;  %v2174_v34 = vld [vmem:[%s4161_s1 + $0x460] sm:$0xff]  ;;  %v3258_v9 = vpack.c.bf16 %v1624_v2, %v1623_v1 }
  0xb2   : > { %3203 = vmatprep.subr.bf16.mxu0 %v3202_v8  ;;  %v3214_v25 = vpack.c.bf16 %v2175_v21, %v2174_v34  ;;  %v1631_v34 = vld [vmem:[%s4164_s4 + $0x50] sm:$0xff]  ;;  %v1632_v21 = vld [vmem:[%s4164_s4 + $0x58] sm:$0xff] }
  0xb4   : > { %2800 = vmatmul.mubr.f32.gmra.mrb[6].mxu0 %v2137_v17  ;;  %v1628_v17 = vld [vmem:[%s4164_s4 + $0x38] sm:$0xff] }
  0xb5   : > { %3205 = vmatpush3.bf16.msra.mxu0 %v3202_v8  ;;  %2834 = vmatprep.mubr.f32.mxu0 %v3834_v12  ;;  %v2177_v12 = vld [vmem:[%s4161_s1 + $0x478] sm:$0xff]  ;;  %v1678_v8 = vmax.f32 %v1670_v4, 0.0 }
  0xb6   : > { %3207 = vmatprep.subr.bf16.mxu0 %v3206_v18  ;;  %v3218_v29 = vpack.c.bf16 %v2177_v12, %v2176_v27  ;;  %v1641_v27 = vld [vmem:[%s4047_s23 + $0x20] sm:$0xff] }
  0xb7   : > { %v1656_v12 = vmul.f32 %v4054_v50, %v1641_v27 }
  0xb9   : > { %3209 = vmatpush3.bf16.msra.mxu0 %v3206_v18  ;;  %v3266_v18 = vpack.c.bf16 %v1628_v17, %v1627_v15  ;;  %v1671_v36 = vadd.f32 %v4059_v51, %v1656_v12 }
  0xba   : > { %3211 = vmatprep.subr.bf16.mxu0 %v3210_v28 }
  0xbb   : > { %v1679_v40 = vmax.f32 %v1671_v36, 0.0 }
  0xbd   : > { %3213 = vmatpush3.bf16.msra.mxu0 %v3210_v28  ;;  %v3270_v28 = vpack.c.bf16 %v1630_v19, %v1629_v26 }
  0xbe   : > { %3215 = vmatprep.subr.bf16.mxu0 %v3214_v25 }
  0xc1   : > { %3217 = vmatpush3.bf16.msra.mxu0 %v3214_v25  ;;  %v3274_v25 = vpack.c.bf16 %v1632_v21, %v1631_v34 }
  0xc2   : > { %3219 = vmatprep.subr.bf16.mxu0 %v3218_v29 }
  0xc5   : > { %3221 = vmatpush3.bf16.msra.mxu0 %v3218_v29  ;;  %v1642_v29 = vld [vmem:[%s4047_s23 + $0x28] sm:$0xff] }
  0xc6   : > { %v1657_v30 = vmul.f32 %v4054_v50, %v1642_v29 }
  0xc8   : > { %2835 = vmatmul.mubr.f32.vlgmr.msra.gmra.mrb[0].mxu0 %v3837_v13  ;;  %v1691_v13 = vld [vmem:[%s4168_s8 + $0x40] sm:$0xff]  ;;  %v1672_v37 = vadd.f32 %v4059_v51, %v1657_v30 }
  0xc9   : > { %2837 = vmatprep.mubr.f32.mxu0 %v3850_v23  ;;  %v3238_v23 = vpack.c.bf16 %v1692_v48, %v1691_v13  ;;  %v1673_v13 = vadd.f32 %v4059_v51, %v1658_v43  ;;  %v1674_v48 = vadd.f32 %v4059_v51, %v1659_v47 }
  0xca   : > { %v1680_v45 = vmax.f32 %v1672_v37, 0.0 }
  0xcb   : > { %3239 = vmatprep.subr.bf16.mxu1 %v3238_v23 }
  0xcc   : > { %2838 = vmatmul.mubr.f32.gmra.mrb[2].mxu0 %v3853_v24  ;;  %v1694_v24 = vld [vmem:[%s4168_s8 + $0x58] sm:$0xff]  ;;  %3241 = vmatpush3.bf16.msra.mxu1 %v3238_v23  ;;  %v1681_v23 = vmax.f32 %v1673_v13, 0.0 }
  0xcd   : > { %2840 = vmatprep.mubr.f32.mxu0 %v3865_v31  ;;  %v1637_v31 = vld [vmem:[%s4047_s23] sm:$0xff] }
  0xce   : > { %v1652_v53 = vmul.f32 %v4054_v50, %v1637_v31  ;;  %v1682_v31 = vmax.f32 %v1674_v48, 0.0 }
  0xd0   : > { %2841 = vmatmul.mubr.f32.gmra.mrb[4].mxu0 %v3868_v33  ;;  %v3242_v33 = vpack.c.bf16 %v1694_v24, %v1693_v49  ;;  %v1667_v54 = vadd.f32 %v4059_v51, %v1652_v53  ;;  %v1635_v49 = vld [vmem:[%s4164_s4 + $0x70] sm:$0xff]  ;;  %v1636_v24 = vld [vmem:[%s4164_s4 + $0x78] sm:$0xff] }
  0xd1   : > { %2843 = vmatprep.mubr.f32.mxu0 %v3880_v39 }
  0xd2   : > { %v1675_v39 = vmax.f32 %v1667_v54, 0.0  ;;  %3243 = vmatprep.subr.bf16.mxu1 %v3242_v33 }
  0xd3   : > { %3245 = vmatpush3.bf16.msra.mxu1 %v3242_v33 }
  0xd4   : > { %2844 = vmatmul.mubr.f32.gmra.mrb[6].mxu0 %v2161_v52  ;;  %2878 = vmatprep.mubr.f32.mxu1 %v1675_v39  ;;  %v3282_v52 = vpack.c.bf16 %v1636_v24, %v1635_v49 }
  0xd5   : > { %3247 = vmatprep.subr.bf16.mxu1 %v3246_v56 }
  0xd7   : > { %3249 = vmatpush3.bf16.msra.mxu1 %v3246_v56  ;;  %v2178_v56 = vld [vmem:[%s4162_s2] ss:$0 sm:$0xff] }
  0xd8   : > { %3251 = vmatprep.subr.bf16.mxu1 %v3250_v59 }
  0xdb   : > { %3253 = vmatpush3.bf16.msra.mxu1 %v3250_v59 }
  0xdc   : > { %3255 = vmatprep.subr.bf16.mxu1 %v3254_v0 }
  0xde   : > { %2879 = vmatmul.mubr.f32.vlgmr.msra.gmra.mrb[8].mxu1 %v1676_v3 }
  0xdf   : > { %3257 = vmatpush3.bf16.msra.mxu1 %v3254_v0  ;;  %2881 = vmatprep.mubr.f32.mxu1 %v1677_v5 }
  0xe0   : > { %3259 = vmatprep.subr.bf16.mxu1 %v3258_v9 }
  0xe2   : > { %2882 = vmatmul.mubr.f32.gmra.mrb[10].mxu1 %v1678_v8 }
  0xe3   : > { %3261 = vmatpush3.bf16.msra.mxu1 %v3258_v9  ;;  %2884 = vmatprep.mubr.f32.mxu1 %v1679_v40 }
  0xe4   : > { %3263 = vmatprep.subr.bf16.mxu1 %v3262_v16 }
  0xe6   : > { %2885 = vmatmul.mubr.f32.gmra.mrb[12].mxu1 %v1680_v45 }
  0xe7   : > { %3265 = vmatpush3.bf16.msra.mxu1 %v3262_v16  ;;  %2887 = vmatprep.mubr.f32.mxu1 %v1681_v23 }
  0xe8   : > { %3267 = vmatprep.subr.bf16.mxu1 %v3266_v18 }
  0xea   : > { %2888 = vmatmul.mubr.f32.gmra.mrb[14].mxu1 %v1682_v31 }
  0xeb   : > { %3269 = vmatpush3.bf16.msra.mxu1 %v3266_v18 }
  0xec   : > { %3271 = vmatprep.subr.bf16.mxu1 %v3270_v28 }
  0xef   : > { %3273 = vmatpush3.bf16.msra.mxu1 %v3270_v28 }
  0xf0   : > { %3275 = vmatprep.subr.bf16.mxu1 %v3274_v25 }
  0xf3   : > { %3277 = vmatpush3.bf16.msra.mxu1 %v3274_v25 }
  0xf4   : > { %3279 = vmatprep.subr.bf16.mxu1 %v3278_v46 }
  0xf7   : > { %3281 = vmatpush3.bf16.msra.mxu1 %v3278_v46 }
  0xf8   : > { %3283 = vmatprep.subr.bf16.mxu1 %v3282_v52 }
  0xfb   : > { %3285 = vmatpush3.bf16.msra.mxu1 %v3282_v52 }
 0x13d   : > { %v2572_v50 = vpop.f32.mrb[0].mxu1 }
 0x13e   : > { %v704_v53 = vpop.f32.mrb[1].mxu1 }
 0x141   : > { %v2575_v33 = vpop.f32.mrb[2].mxu1 }
 0x142   : > { %v714_v51 = vpop.f32.mrb[3].mxu1 }
 0x145   : > { %v2578_v54 = vpop.f32.mrb[4].mxu1 }
 0x146   : > { %v724_v10 = vpop.f32.mrb[5].mxu1 }
 0x149   : > { %v2581_v20 = vpop.f32.mrb[6].mxu1 }
 0x14a   : > { %v734_v39 = vpop.f32.mrb[7].mxu1 }
 0x19b   : > { %v2836_v55 = vpop.f32.mrb[0].mxu0 }
 0x19c   : > { %v3286_v22 = vadd.f32 %v2836_v55, %v2572_v50  ;;  %v1536_v32 = vpop.f32.mrb[1].mxu0 }
 0x19d   : > { %v3287_v35 = vadd.f32 %v1536_v32, %v704_v53 }
 0x19e   : > { %v1591_v41 = vmul.f32 %v3286_v22, %v2178_v56 }
 0x19f   : > { %v1590_v58 = vmul.f32 %v3287_v35, %v2178_v56  ;;  %v2839_v59 = vpop.f32.mrb[2].mxu0 }
 0x1a0   : > { %v1606_v60 = vadd.f32 %v2179_v57, %v1591_v41  ;;  %v3288_v6 = vadd.f32 %v2839_v59, %v2575_v33  ;;  %v1546_v61 = vpop.f32.mrb[3].mxu0 }
 0x1a1   : > { %v3289_v62 = vadd.f32 %v1546_v61, %v714_v51  ;;  %v1605_v63 = vadd.f32 %v2179_v57, %v1590_v58 }
 0x1a2   : > { %v1593_v0 = vmul.f32 %v3288_v6, %v2178_v56  ;;  %v1614_v4 = vmax.f32 %v1606_v60, 0.0 }
 0x1a3   : > { %v1592_v1 = vmul.f32 %v3289_v62, %v2178_v56  ;;  %v2842_v2 = vpop.f32.mrb[4].mxu0  ;;  %v1613_v3 = vmax.f32 %v1605_v63, 0.0 }
 0x1a4   : > { %v3290_v5 = vadd.f32 %v2842_v2, %v2578_v54  ;;  %v1556_v9 = vpop.f32.mrb[5].mxu0  ;;  %v1608_v11 = vadd.f32 %v2179_v57, %v1593_v0 }
 0x1a5   : > { %v3291_v14 = vadd.f32 %v1556_v9, %v724_v10  ;;  %2922 = vmatprep.mubr.f32.mxu1 %v1613_v3  ;;  %v1607_v8 = vadd.f32 %v2179_v57, %v1592_v1 }
 0x1a6   : > { %v1595_v16 = vmul.f32 %v3290_v5, %v2178_v56  ;;  %2923 = vmatmul.mubr.f32.vlgmr.msra.gmra.mrb[8].mxu1 %v1614_v4  ;;  %v1616_v28 = vmax.f32 %v1608_v11, 0.0 }
 0x1a7   : > { %v1594_v15 = vmul.f32 %v3291_v14, %v2178_v56  ;;  %v2845_v17 = vpop.f32.mrb[6].mxu0  ;;  %v1615_v18 = vmax.f32 %v1607_v8, 0.0 }
 0x1a8   : > { %v3292_v26 = vadd.f32 %v2845_v17, %v2581_v20  ;;  %v1566_v19 = vpop.f32.mrb[7].mxu0  ;;  %v1610_v34 = vadd.f32 %v2179_v57, %v1595_v16 }
 0x1a9   : > { %v3293_v21 = vadd.f32 %v1566_v19, %v734_v39  ;;  %2925 = vmatprep.mubr.f32.mxu1 %v1615_v18  ;;  %v1609_v25 = vadd.f32 %v2179_v57, %v1594_v15 }
 0x1aa   : > { %v1597_v27 = vmul.f32 %v3292_v26, %v2178_v56  ;;  %2926 = vmatmul.mubr.f32.gmra.mrb[10].mxu1 %v1616_v28  ;;  %v1618_v30 = vmax.f32 %v1610_v34, 0.0 }
 0x1ab   : > { %v1596_v12 = vmul.f32 %v3293_v21, %v2178_v56  ;;  %v1617_v29 = vmax.f32 %v1609_v25, 0.0 }
 0x1ac   : > { %v1612_v36 = vadd.f32 %v2179_v57, %v1597_v27 }
 0x1ad   : > { %2928 = vmatprep.mubr.f32.mxu1 %v1617_v29  ;;  %v1611_v37 = vadd.f32 %v2179_v57, %v1596_v12 }
 0x1ae   : > { %2929 = vmatmul.mubr.f32.gmra.mrb[12].mxu1 %v1618_v30  ;;  %v1620_v40 = vmax.f32 %v1612_v36, 0.0 }
 0x1af   : > { %v1619_v38 = vmax.f32 %v1611_v37, 0.0 }
 0x1b1   : > { %2931 = vmatprep.mubr.f32.mxu1 %v1619_v38 }
 0x1b2   : > { %2932 = vmatmul.mubr.f32.gmra.mrb[14].mxu1 %v1620_v40 }
 0x279   : > { %v2924_v7 = vpop.f32.mrb[8].mxu1 }
 0x27a   : > { %1910 = vst [vmem:[%s352_s21 + $0x8] sm:$0xff] %v2924_v7  ;;  %v1870_v42 = vpop.f32.mrb[9].mxu1 }
 0x27b   : > { %1909 = vst [vmem:[%s352_s21] sm:$0xff] %v1870_v42 }
 0x27d   : > { %v2927_v43 = vpop.f32.mrb[10].mxu1 }
 0x27e   : > { %1912 = vst [vmem:[%s352_s21 + $0x18] sm:$0xff] %v2927_v43  ;;  %v1880_v44 = vpop.f32.mrb[11].mxu1 }
 0x27f   : > { %1911 = vst [vmem:[%s352_s21 + $0x10] sm:$0xff] %v1880_v44 }
 0x281   : > { %v2930_v45 = vpop.f32.mrb[12].mxu1 }
 0x282   : > { %1914 = vst [vmem:[%s352_s21 + $0x28] sm:$0xff] %v2930_v45  ;;  %v1890_v46 = vpop.f32.mrb[13].mxu1 }
 0x283   : > { %1913 = vst [vmem:[%s352_s21 + $0x20] sm:$0xff] %v1890_v46 }
 0x285   : > { %v2933_v47 = vpop.f32.mrb[14].mxu1 }
 0x286   : > { %1916 = vst [vmem:[%s352_s21 + $0x38] sm:$0xff] %v2933_v47  ;;  %v1900_v13 = vpop.f32.mrb[15].mxu1 }
 0x287   : > { %1915 = vst [vmem:[%s352_s21 + $0x30] sm:$0xff] %v1900_v13 }
 0x288 PF: > { %s19_s30 = sadd.s32 1, %s3373_s30  }
 0x289   : > { %p16_p4 = scmp.ge.s32.totalorder %s19_s30, 4  }
 0x28b   :  { %18 = sbr.rel (!%p16_p4) target bundleno = 1 (0x1), region = 102 }

</bundles_post_ra>
